<compile_context>
chip_gen: v6e
topology: v6e:2x2x1
jax: 0.10.0
libtpu: 0.0.40
codegen_flags: <defaults>
</compile_context>

<pallas_src>
import numpy as np

import jax
import jax.numpy as jnp
from jax import lax
from jax.experimental import pallas as pl
from jax.experimental.pallas import tpu as pltpu


def _elu(x):
    return jnp.where(x > 0, x, jnp.exp(jnp.minimum(x, 0.0)) - 1.0)


def _round_up(a, m):
    return ((a + m - 1) // m) * m


def _make_kernel(H, W, Bt, C, KOUT, gemm_dtype):
    HO0, WO0 = H - 2, W - 2          # after conv0 (valid 3x3)
    HP0, WP0 = HO0 // 2, WO0 // 2    # after pool0 (2x2, floor)
    HC0 = 2 * HP0                    # h rows actually consumed by pool0
    HO1, WO1 = HP0 - 2, WP0 - 2      # after conv1 (valid 3x3)
    HP1, WP1 = HO1 // 2, WO1 // 2    # after pool1 (2x2, floor)
    HC1 = 2 * HP1                    # h rows actually consumed by pool1
    K0, K1 = WP0 * C, WP1 * C        # fused (width, channel) lane extents
    M0, M1 = HC0 * Bt, HC1 * Bt      # GEMM M dims (rows = (h, b), b minor)

    if gemm_dtype is None:
        cast = lambda v: v
    else:
        cast = lambda v: v.astype(gemm_dtype)

    def kernel(x_ref, w0_ref, b0_ref, w1_ref, t1_ref, wd_ref, bd_ref, out_ref):
        # Hoisted weight reads (one load each per grid step).
        x = x_ref[...]                      # (H, Bt, W)   dense, batch on sublanes
        w0 = cast(w0_ref[...])              # (2, 3, W,  K0)  [parity, kh]
        w1 = cast(w1_ref[...])              # (2, 3, K0, K1)  [parity, kh]
        wd = cast(wd_ref[...])              # (HP1, K1, KOUT)

        # ---- conv0 + folded BN0: banded GEMMs, accumulate the 3 h-taps ------
        ze = jnp.zeros((M0, K0), jnp.float32)   # even output-width columns
        zo = jnp.zeros((M0, K0), jnp.float32)   # odd  output-width columns
        for kh in range(3):
            lhs = cast(x[kh:kh + HC0].reshape(M0, W))     # 8-aligned leading merge
            ze = ze + jnp.dot(lhs, w0[0, kh], preferred_element_type=jnp.float32)
            zo = zo + jnp.dot(lhs, w0[1, kh], preferred_element_type=jnp.float32)

        # ---- pool0 (2x2, floor): h-pairs via leading reshape, w-pairs via the
        #      even/odd split; bias + ELU after the max (both commute). -------
        ze = ze.reshape(HP0, 2, Bt, K0)
        zo = zo.reshape(HP0, 2, Bt, K0)
        p0 = jnp.maximum(jnp.maximum(ze[:, 0], ze[:, 1]),
                         jnp.maximum(zo[:, 0], zo[:, 1]))     # (HP0, Bt, K0)
        p0 = _elu(p0 + b0_ref[...])                           # bias (1, K0)

        # ---- conv1 + folded BN1: banded GEMMs with K = WP0*C ----------------
        z1e = jnp.zeros((M1, K1), jnp.float32)
        z1o = jnp.zeros((M1, K1), jnp.float32)
        for kh in range(3):
            lhs = cast(p0[kh:kh + HC1].reshape(M1, K0))
            z1e = z1e + jnp.dot(lhs, w1[0, kh], preferred_element_type=jnp.float32)
            z1o = z1o + jnp.dot(lhs, w1[1, kh], preferred_element_type=jnp.float32)

        # ---- pool1, bias, ELU (same trick) ----------------------------------
        z1e = z1e.reshape(HP1, 2, Bt, K1)
        z1o = z1o.reshape(HP1, 2, Bt, K1)
        p1 = jnp.maximum(jnp.maximum(z1e[:, 0], z1e[:, 1]),
                         jnp.maximum(z1o[:, 0], z1o[:, 1]))   # (HP1, Bt, K1)
        p1 = _elu(p1 + t1_ref[...])

        # ---- dense head: accumulate per-h-row GEMMs (flatten order (h,w,c)),
        #      then ELU + stable log-softmax, single (Bt, KOUT) store. --------
        acc = jnp.zeros((Bt, KOUT), jnp.float32)
        for i in range(HP1):
            acc = acc + jnp.dot(cast(p1[i]), wd[i],
                                preferred_element_type=jnp.float32)
        logits = acc + bd_ref[...]
        e = _elu(logits)
        m = jnp.max(e, axis=-1, keepdims=True)
        lse = jnp.log(jnp.sum(jnp.exp(e - m), axis=-1, keepdims=True)) + m
        out_ref[...] = (e - lse).astype(out_ref.dtype)

    return kernel


def cnnlstm_forward(x, params, *, block_b=256, gemm_dtype=None,
                    vmem_budget_bytes=16 * 1024 * 1024):
    """x: (B, time, eeg_channel, 1) float32 -> (B, KOUT) log-probabilities.

    `params` must come from `fold_params`.  `gemm_dtype=jnp.bfloat16` casts the
    MXU operands (recommended on v6e/v7x); accumulation stays float32.
    """
    B, H, W, Cin = x.shape
    assert Cin == 1, "input channel dim must be 1"
    w0s, b0t, w1s, t1t, wdr, bdr = params

    HO0, WO0 = H - 2, W - 2
    HP0, WP0 = HO0 // 2, WO0 // 2
    HC0 = 2 * HP0
    HO1, WO1 = HP0 - 2, WP0 - 2
    HP1, WP1 = HO1 // 2, WO1 // 2
    HC1 = 2 * HP1
    assert HP1 >= 1 and WP1 >= 1, "input spatial dims too small for this model"
    C = b0t.shape[1] // WP0
    K0, K1 = WP0 * C, WP1 * C
    KOUT = wdr.shape[-1]
    assert w0s.shape == (2, 3, W, K0)
    assert w1s.shape == (2, 3, K0, K1)
    assert wdr.shape == (HP1, K1, KOUT)

    # Batch tile: batch rides the sublane axis, so multiples of 8 suffice.
    # Size it against a VMEM budget, the requested block_b, and keep >=2 grid
    # steps when the batch allows (v7x has two TensorCores; grid is "parallel").
    per_elem_bytes = 4 * (2 * H * W + 3 * HC0 * K0 + HP0 * K0
                          + HC1 * K0 + 3 * HC1 * K1 + 2 * HP1 * K1)
    bt = min(int(block_b), max(8, vmem_budget_bytes // max(per_elem_bytes, 1)))
    B8 = _round_up(B, 8)
    if B8 >= 16:
        bt = min(bt, _round_up(B8 // 2, 8))
    bt = max(8, (bt // 8) * 8)
    bt = min(bt, B8)
    B_pad = _round_up(B, bt)

    # Dense (H, B_pad, W) input: batch on sublanes, width on lanes, no
    # singleton minor dim, no im2col expansion in HBM.
    xk = jnp.transpose(jnp.squeeze(x, -1), (1, 0, 2)).astype(jnp.float32)
    if B_pad != B:
        xk = jnp.pad(xk, ((0, 0), (0, B_pad - B), (0, 0)))

    kernel = _make_kernel(H, W, bt, C, KOUT, gemm_dtype)

    out = pl.pallas_call(
        kernel,
        out_shape=jax.ShapeDtypeStruct((B_pad, KOUT), jnp.float32),
        grid=(B_pad // bt,),
        in_specs=[
            pl.BlockSpec((H, bt, W), lambda g: (0, g, 0)),
            pl.BlockSpec(w0s.shape, lambda g: (0, 0, 0, 0)),
            pl.BlockSpec(b0t.shape, lambda g: (0, 0)),
            pl.BlockSpec(w1s.shape, lambda g: (0, 0, 0, 0)),
            pl.BlockSpec(t1t.shape, lambda g: (0, 0)),
            pl.BlockSpec(wdr.shape, lambda g: (0, 0, 0)),
            pl.BlockSpec(bdr.shape, lambda g: (0, 0)),
        ],
        out_specs=pl.BlockSpec((bt, KOUT), lambda g: (g, 0)),
        compiler_params=pltpu.CompilerParams(
            dimension_semantics=("parallel",),
            vmem_limit_bytes=32 * 1024 * 1024),
    )(xk, w0s, b0t, w1s, t1t, wdr, bdr)
    return out[:B]


def _banded(wf, w_in, c_in, wp_out, parity):
    """Per-kh banded weight blocks for a valid 3x3 conv whose width axis is
    fused with the channel axis on lanes; only output columns with
    w_out = 2*wp + parity (the ones pool keeps for this parity) are emitted."""
    c_out = wf.shape[-1]
    kin = w_in * c_in
    out = np.zeros((3, kin, wp_out * c_out), np.float32)
    for kh in range(3):
        for wp in range(wp_out):
            w_o = 2 * wp + parity
            for kw in range(3):
                wi = w_o + kw
                out[kh, wi * c_in:(wi + 1) * c_in,
                    wp * c_out:(wp + 1) * c_out] = wf[kh, kw].reshape(c_in, c_out)
    return out


def fold_params(input_hw, w0, b0, g0, be0, m0, v0, w1, g1, be1, m1, v1, wd, bd,
                eps=1e-5):
    """Fold eval-mode BatchNorm into the convs and build the banded GEMM
    weights expected by the kernel (offline, host-side prep)."""
    H, W = input_hw
    (w0, b0, g0, be0, m0, v0, w1, g1, be1, m1, v1, wd, bd) = [
        np.asarray(a, np.float32)
        for a in (w0, b0, g0, be0, m0, v0, w1, g1, be1, m1, v1, wd, bd)]
    C = w0.shape[-1]
    KOUT = wd.shape[-1]
    HO0, WO0 = H - 2, W - 2
    HP0, WP0 = HO0 // 2, WO0 // 2
    HO1, WO1 = HP0 - 2, WP0 - 2
    HP1, WP1 = HO1 // 2, WO1 // 2
    K0, K1 = WP0 * C, WP1 * C

    s0 = g0 / np.sqrt(v0 + eps)
    w0f = w0[:, :, 0, :] * s0                  # (3, 3, C)   BN0 scale folded
    b0f = (b0 - m0) * s0 + be0                 # (C,)
    s1 = g1 / np.sqrt(v1 + eps)
    w1f = w1 * s1                              # (3, 3, C, C)
    t1f = be1 - m1 * s1                        # (C,)

    w0s = np.stack([_banded(w0f, W, 1, WP0, 0), _banded(w0f, W, 1, WP0, 1)])
    w1s = np.stack([_banded(w1f, WP0, C, WP1, 0), _banded(w1f, WP0, C, WP1, 1)])
    b0t = np.tile(b0f, WP0).reshape(1, K0)
    t1t = np.tile(t1f, WP1).reshape(1, K1)
    assert wd.shape[0] == HP1 * K1
    wdr = wd.reshape(HP1, K1, KOUT)            # flatten order (h, w, c)
    bdr = bd.reshape(1, KOUT)
    return tuple(jnp.asarray(a) for a in (w0s, b0t, w1s, t1t, wdr, bdr))


def reference_forward(x, raw):
    """Pure-JAX reference with identical semantics (for validation)."""
    (w0, b0, g0, be0, m0, v0, w1, g1, be1, m1, v1, wd, bd, eps) = raw
    dn = ('NHWC', 'HWIO', 'NHWC')
    hp = lax.Precision.HIGHEST
    y = lax.conv_general_dilated(x, w0, (1, 1), 'VALID', dimension_numbers=dn,
                                 precision=hp) + b0
    y = _elu((y - m0) / jnp.sqrt(v0 + eps) * g0 + be0)
    y = lax.reduce_window(y, -jnp.inf, lax.max, (1, 2, 2, 1), (1, 2, 2, 1), 'VALID')
    y = lax.conv_general_dilated(y, w1, (1, 1), 'VALID', dimension_numbers=dn,
                                 precision=hp)
    y = _elu((y - m1) / jnp.sqrt(v1 + eps) * g1 + be1)
    y = lax.reduce_window(y, -jnp.inf, lax.max, (1, 2, 2, 1), (1, 2, 2, 1), 'VALID')
    f = y.reshape(y.shape[0], -1)              # flatten order (h, w, c)
    e = _elu(jnp.dot(f, wd, precision=hp) + bd)
    return jax.nn.log_softmax(e, axis=1)


if __name__ == "__main__":
    key = jax.random.PRNGKey(0)
    B, T, CEEG = 2, 16, 16                      # (batch, time, eeg_channel, 1)
    kx, kp = jax.random.split(key)
    x = jax.random.normal(kx, (B, T, CEEG, 1), jnp.float32)

    C, KOUT = 32, 4
    eps = 1e-5
    HO0, WO0 = T - 2, CEEG - 2
    HP0, WP0 = HO0 // 2, WO0 // 2
    HO1, WO1 = HP0 - 2, WP0 - 2
    HP1, WP1 = HO1 // 2, WO1 // 2
    dense_in = HP1 * WP1 * C

    ks = jax.random.split(kp, 13)
    w0 = 0.2 * jax.random.normal(ks[0], (3, 3, 1, C), jnp.float32)     # HWIO
    b0 = 0.1 * jax.random.normal(ks[1], (C,), jnp.float32)
    g0 = 1.0 + 0.1 * jax.random.normal(ks[2], (C,), jnp.float32)       # BN0 gamma
    be0 = 0.1 * jax.random.normal(ks[3], (C,), jnp.float32)            # BN0 beta
    m0 = 0.1 * jax.random.normal(ks[4], (C,), jnp.float32)             # BN0 mean
    v0 = 1.0 + 0.1 * jax.random.uniform(ks[5], (C,), jnp.float32)      # BN0 var
    w1 = 0.08 * jax.random.normal(ks[6], (3, 3, C, C), jnp.float32)    # HWIO
    g1 = 1.0 + 0.1 * jax.random.normal(ks[7], (C,), jnp.float32)
    be1 = 0.1 * jax.random.normal(ks[8], (C,), jnp.float32)
    m1 = 0.1 * jax.random.normal(ks[9], (C,), jnp.float32)
    v1 = 1.0 + 0.1 * jax.random.uniform(ks[10], (C,), jnp.float32)
    wd = 0.1 * jax.random.normal(ks[11], (dense_in, KOUT), jnp.float32)
    bd = 0.1 * jax.random.normal(ks[12], (KOUT,), jnp.float32)

    params = fold_params((T, CEEG), w0, b0, g0, be0, m0, v0,
                         w1, g1, be1, m1, v1, wd, bd, eps)

    out = jax.block_until_ready(cnnlstm_forward(x, params))
    ref = jax.block_until_ready(reference_forward(
        x, (w0, b0, g0, be0, m0, v0, w1, g1, be1, m1, v1, wd, bd, eps)))

    assert out.shape == (B, KOUT)
    err = float(jnp.max(jnp.abs(out - ref)))
    # f32 path typically matches to ~1e-5; 1e-2 bound leaves headroom for
    # reduced-precision MXU passes while still catching any layout/semantics bug.
    assert err < 1e-2, f"mismatch vs reference: {err}"
    print("KERNEL_OK")
</pallas_src>

<mosaic_0001>
module attributes {stable_mosaic.version = 11 : i64} {
  func.func @kernel(%arg0: i32, %arg1: memref<16x8x16xf32, #tpu.memory_space<vmem>>, %arg2: memref<2x3x16x224xf32, #tpu.memory_space<vmem>>, %arg3: memref<1x224xf32, #tpu.memory_space<vmem>>, %arg4: memref<2x3x224x64xf32, #tpu.memory_space<vmem>>, %arg5: memref<1x64xf32, #tpu.memory_space<vmem>>, %arg6: memref<2x64x4xf32, #tpu.memory_space<vmem>>, %arg7: memref<1x4xf32, #tpu.memory_space<vmem>>, %arg8: memref<8x4xf32, #tpu.memory_space<vmem>>) attributes {dimension_semantics = [#tpu.dimension_semantics<parallel>], iteration_bounds = array<i64: 1>, scalar_prefetch = 0 : i64, scratch_operands = 0 : i64, tpu.core_type = #tpu.core_type<tc>, window_params = [{transform_indices = @transform_0, window_bounds = array<i64: 16, 8, 16>}, {pipeline_mode = #tpu.pipeline_mode<synchronous>, transform_indices = @transform_1, window_bounds = array<i64: 2, 3, 16, 224>}, {pipeline_mode = #tpu.pipeline_mode<synchronous>, transform_indices = @transform_2, window_bounds = array<i64: 1, 224>}, {pipeline_mode = #tpu.pipeline_mode<synchronous>, transform_indices = @transform_3, window_bounds = array<i64: 2, 3, 224, 64>}, {pipeline_mode = #tpu.pipeline_mode<synchronous>, transform_indices = @transform_4, window_bounds = array<i64: 1, 64>}, {pipeline_mode = #tpu.pipeline_mode<synchronous>, transform_indices = @transform_5, window_bounds = array<i64: 2, 64, 4>}, {pipeline_mode = #tpu.pipeline_mode<synchronous>, transform_indices = @transform_6, window_bounds = array<i64: 1, 4>}, {transform_indices = @transform_7, window_bounds = array<i64: 8, 4>}]} {
    %c0 = arith.constant 0 : index
    %c0_0 = arith.constant 0 : index
    %c0_1 = arith.constant 0 : index
    %0 = vector.load %arg1[%c0, %c0_0, %c0_1] : memref<16x8x16xf32, #tpu.memory_space<vmem>>, vector<16x8x16xf32>
    %c0_2 = arith.constant 0 : index
    %c0_3 = arith.constant 0 : index
    %c0_4 = arith.constant 0 : index
    %c0_5 = arith.constant 0 : index
    %1 = vector.load %arg2[%c0_2, %c0_3, %c0_4, %c0_5] : memref<2x3x16x224xf32, #tpu.memory_space<vmem>>, vector<2x3x16x224xf32>
    %c0_6 = arith.constant 0 : index
    %c0_7 = arith.constant 0 : index
    %c0_8 = arith.constant 0 : index
    %c0_9 = arith.constant 0 : index
    %2 = vector.load %arg4[%c0_6, %c0_7, %c0_8, %c0_9] : memref<2x3x224x64xf32, #tpu.memory_space<vmem>>, vector<2x3x224x64xf32>
    %c0_10 = arith.constant 0 : index
    %c0_11 = arith.constant 0 : index
    %c0_12 = arith.constant 0 : index
    %3 = vector.load %arg6[%c0_10, %c0_11, %c0_12] : memref<2x64x4xf32, #tpu.memory_space<vmem>>, vector<2x64x4xf32>
    %cst = arith.constant 0.000000e+00 : f32
    %4 = vector.broadcast %cst : f32 to vector<112x224xf32>
    %cst_13 = arith.constant 0.000000e+00 : f32
    %5 = vector.broadcast %cst_13 : f32 to vector<112x224xf32>
    %6 = vector.extract_strided_slice %0 {offsets = [0, 0, 0], sizes = [14, 8, 16], strides = [1, 1, 1]} : vector<16x8x16xf32> to vector<14x8x16xf32>
    %7 = vector.shape_cast %6 : vector<14x8x16xf32> to vector<112x16xf32>
    %8 = vector.extract_strided_slice %1 {offsets = [0, 0, 0, 0], sizes = [1, 1, 16, 224], strides = [1, 1, 1, 1]} : vector<2x3x16x224xf32> to vector<1x1x16x224xf32>
    %9 = vector.shape_cast %8 : vector<1x1x16x224xf32> to vector<16x224xf32>
    %cst_14 = arith.constant dense<0.000000e+00> : vector<112x224xf32>
    %10 = tpu.matmul %7, %9, %cst_14 {dimension_numbers = #tpu.dot_dimension_numbers<[1], [0], [0], [1], [0, 0, 1, 1], [], []>} : vector<112x16xf32>, vector<16x224xf32>, vector<112x224xf32> -> vector<112x224xf32>
    %11 = arith.addf %4, %10 : vector<112x224xf32>
    %12 = vector.extract_strided_slice %1 {offsets = [1, 0, 0, 0], sizes = [1, 1, 16, 224], strides = [1, 1, 1, 1]} : vector<2x3x16x224xf32> to vector<1x1x16x224xf32>
    %13 = vector.shape_cast %12 : vector<1x1x16x224xf32> to vector<16x224xf32>
    %cst_15 = arith.constant dense<0.000000e+00> : vector<112x224xf32>
    %14 = tpu.matmul %7, %13, %cst_15 {dimension_numbers = #tpu.dot_dimension_numbers<[1], [0], [0], [1], [0, 0, 1, 1], [], []>} : vector<112x16xf32>, vector<16x224xf32>, vector<112x224xf32> -> vector<112x224xf32>
    %15 = arith.addf %5, %14 : vector<112x224xf32>
    %16 = vector.extract_strided_slice %0 {offsets = [1, 0, 0], sizes = [14, 8, 16], strides = [1, 1, 1]} : vector<16x8x16xf32> to vector<14x8x16xf32>
    %17 = vector.shape_cast %16 : vector<14x8x16xf32> to vector<112x16xf32>
    %18 = vector.extract_strided_slice %1 {offsets = [0, 1, 0, 0], sizes = [1, 1, 16, 224], strides = [1, 1, 1, 1]} : vector<2x3x16x224xf32> to vector<1x1x16x224xf32>
    %19 = vector.shape_cast %18 : vector<1x1x16x224xf32> to vector<16x224xf32>
    %cst_16 = arith.constant dense<0.000000e+00> : vector<112x224xf32>
    %20 = tpu.matmul %17, %19, %cst_16 {dimension_numbers = #tpu.dot_dimension_numbers<[1], [0], [0], [1], [0, 0, 1, 1], [], []>} : vector<112x16xf32>, vector<16x224xf32>, vector<112x224xf32> -> vector<112x224xf32>
    %21 = arith.addf %11, %20 : vector<112x224xf32>
    %22 = vector.extract_strided_slice %1 {offsets = [1, 1, 0, 0], sizes = [1, 1, 16, 224], strides = [1, 1, 1, 1]} : vector<2x3x16x224xf32> to vector<1x1x16x224xf32>
    %23 = vector.shape_cast %22 : vector<1x1x16x224xf32> to vector<16x224xf32>
    %cst_17 = arith.constant dense<0.000000e+00> : vector<112x224xf32>
    %24 = tpu.matmul %17, %23, %cst_17 {dimension_numbers = #tpu.dot_dimension_numbers<[1], [0], [0], [1], [0, 0, 1, 1], [], []>} : vector<112x16xf32>, vector<16x224xf32>, vector<112x224xf32> -> vector<112x224xf32>
    %25 = arith.addf %15, %24 : vector<112x224xf32>
    %26 = vector.extract_strided_slice %0 {offsets = [2, 0, 0], sizes = [14, 8, 16], strides = [1, 1, 1]} : vector<16x8x16xf32> to vector<14x8x16xf32>
    %27 = vector.shape_cast %26 : vector<14x8x16xf32> to vector<112x16xf32>
    %28 = vector.extract_strided_slice %1 {offsets = [0, 2, 0, 0], sizes = [1, 1, 16, 224], strides = [1, 1, 1, 1]} : vector<2x3x16x224xf32> to vector<1x1x16x224xf32>
    %29 = vector.shape_cast %28 : vector<1x1x16x224xf32> to vector<16x224xf32>
    %cst_18 = arith.constant dense<0.000000e+00> : vector<112x224xf32>
    %30 = tpu.matmul %27, %29, %cst_18 {dimension_numbers = #tpu.dot_dimension_numbers<[1], [0], [0], [1], [0, 0, 1, 1], [], []>} : vector<112x16xf32>, vector<16x224xf32>, vector<112x224xf32> -> vector<112x224xf32>
    %31 = arith.addf %21, %30 : vector<112x224xf32>
    %32 = vector.extract_strided_slice %1 {offsets = [1, 2, 0, 0], sizes = [1, 1, 16, 224], strides = [1, 1, 1, 1]} : vector<2x3x16x224xf32> to vector<1x1x16x224xf32>
    %33 = vector.shape_cast %32 : vector<1x1x16x224xf32> to vector<16x224xf32>
    %cst_19 = arith.constant dense<0.000000e+00> : vector<112x224xf32>
    %34 = tpu.matmul %27, %33, %cst_19 {dimension_numbers = #tpu.dot_dimension_numbers<[1], [0], [0], [1], [0, 0, 1, 1], [], []>} : vector<112x16xf32>, vector<16x224xf32>, vector<112x224xf32> -> vector<112x224xf32>
    %35 = arith.addf %25, %34 : vector<112x224xf32>
    %36 = vector.shape_cast %31 : vector<112x224xf32> to vector<7x2x8x224xf32>
    %37 = vector.shape_cast %35 : vector<112x224xf32> to vector<7x2x8x224xf32>
    %38 = vector.extract_strided_slice %36 {offsets = [0, 0, 0, 0], sizes = [7, 1, 8, 224], strides = [1, 1, 1, 1]} : vector<7x2x8x224xf32> to vector<7x1x8x224xf32>
    %39 = vector.shape_cast %38 : vector<7x1x8x224xf32> to vector<7x8x224xf32>
    %40 = vector.extract_strided_slice %36 {offsets = [0, 1, 0, 0], sizes = [7, 1, 8, 224], strides = [1, 1, 1, 1]} : vector<7x2x8x224xf32> to vector<7x1x8x224xf32>
    %41 = vector.shape_cast %40 : vector<7x1x8x224xf32> to vector<7x8x224xf32>
    %42 = arith.maximumf %39, %41 : vector<7x8x224xf32>
    %43 = vector.extract_strided_slice %37 {offsets = [0, 0, 0, 0], sizes = [7, 1, 8, 224], strides = [1, 1, 1, 1]} : vector<7x2x8x224xf32> to vector<7x1x8x224xf32>
    %44 = vector.shape_cast %43 : vector<7x1x8x224xf32> to vector<7x8x224xf32>
    %45 = vector.extract_strided_slice %37 {offsets = [0, 1, 0, 0], sizes = [7, 1, 8, 224], strides = [1, 1, 1, 1]} : vector<7x2x8x224xf32> to vector<7x1x8x224xf32>
    %46 = vector.shape_cast %45 : vector<7x1x8x224xf32> to vector<7x8x224xf32>
    %47 = arith.maximumf %44, %46 : vector<7x8x224xf32>
    %48 = arith.maximumf %42, %47 : vector<7x8x224xf32>
    %c0_20 = arith.constant 0 : index
    %c0_21 = arith.constant 0 : index
    %49 = vector.load %arg3[%c0_20, %c0_21] : memref<1x224xf32, #tpu.memory_space<vmem>>, vector<1x224xf32>
    %50 = vector.shape_cast %49 : vector<1x224xf32> to vector<1x1x224xf32>
    %51 = vector.broadcast %50 : vector<1x1x224xf32> to vector<7x8x224xf32>
    %52 = arith.addf %48, %51 : vector<7x8x224xf32>
    %cst_22 = arith.constant 0.000000e+00 : f32
    %53 = vector.broadcast %cst_22 : f32 to vector<7x8x224xf32>
    %54 = arith.cmpf ogt, %52, %53 : vector<7x8x224xf32>
    %cst_23 = arith.constant 0.000000e+00 : f32
    %55 = vector.broadcast %cst_23 : f32 to vector<7x8x224xf32>
    %56 = arith.minimumf %52, %55 : vector<7x8x224xf32>
    %57 = math.exp %56 : vector<7x8x224xf32>
    %cst_24 = arith.constant 1.000000e+00 : f32
    %58 = vector.broadcast %cst_24 : f32 to vector<7x8x224xf32>
    %59 = arith.subf %57, %58 : vector<7x8x224xf32>
    %60 = arith.select %54, %52, %59 : vector<7x8x224xi1>, vector<7x8x224xf32>
    %cst_25 = arith.constant 0.000000e+00 : f32
    %61 = vector.broadcast %cst_25 : f32 to vector<32x64xf32>
    %cst_26 = arith.constant 0.000000e+00 : f32
    %62 = vector.broadcast %cst_26 : f32 to vector<32x64xf32>
    %63 = vector.extract_strided_slice %60 {offsets = [0, 0, 0], sizes = [4, 8, 224], strides = [1, 1, 1]} : vector<7x8x224xf32> to vector<4x8x224xf32>
    %64 = vector.shape_cast %63 : vector<4x8x224xf32> to vector<32x224xf32>
    %65 = vector.extract_strided_slice %2 {offsets = [0, 0, 0, 0], sizes = [1, 1, 224, 64], strides = [1, 1, 1, 1]} : vector<2x3x224x64xf32> to vector<1x1x224x64xf32>
    %66 = vector.shape_cast %65 : vector<1x1x224x64xf32> to vector<224x64xf32>
    %cst_27 = arith.constant dense<0.000000e+00> : vector<32x64xf32>
    %67 = tpu.matmul %64, %66, %cst_27 {dimension_numbers = #tpu.dot_dimension_numbers<[1], [0], [0], [1], [0, 0, 1, 1], [], []>} : vector<32x224xf32>, vector<224x64xf32>, vector<32x64xf32> -> vector<32x64xf32>
    %68 = arith.addf %61, %67 : vector<32x64xf32>
    %69 = vector.extract_strided_slice %2 {offsets = [1, 0, 0, 0], sizes = [1, 1, 224, 64], strides = [1, 1, 1, 1]} : vector<2x3x224x64xf32> to vector<1x1x224x64xf32>
    %70 = vector.shape_cast %69 : vector<1x1x224x64xf32> to vector<224x64xf32>
    %cst_28 = arith.constant dense<0.000000e+00> : vector<32x64xf32>
    %71 = tpu.matmul %64, %70, %cst_28 {dimension_numbers = #tpu.dot_dimension_numbers<[1], [0], [0], [1], [0, 0, 1, 1], [], []>} : vector<32x224xf32>, vector<224x64xf32>, vector<32x64xf32> -> vector<32x64xf32>
    %72 = arith.addf %62, %71 : vector<32x64xf32>
    %73 = vector.extract_strided_slice %60 {offsets = [1, 0, 0], sizes = [4, 8, 224], strides = [1, 1, 1]} : vector<7x8x224xf32> to vector<4x8x224xf32>
    %74 = vector.shape_cast %73 : vector<4x8x224xf32> to vector<32x224xf32>
    %75 = vector.extract_strided_slice %2 {offsets = [0, 1, 0, 0], sizes = [1, 1, 224, 64], strides = [1, 1, 1, 1]} : vector<2x3x224x64xf32> to vector<1x1x224x64xf32>
    %76 = vector.shape_cast %75 : vector<1x1x224x64xf32> to vector<224x64xf32>
    %cst_29 = arith.constant dense<0.000000e+00> : vector<32x64xf32>
    %77 = tpu.matmul %74, %76, %cst_29 {dimension_numbers = #tpu.dot_dimension_numbers<[1], [0], [0], [1], [0, 0, 1, 1], [], []>} : vector<32x224xf32>, vector<224x64xf32>, vector<32x64xf32> -> vector<32x64xf32>
    %78 = arith.addf %68, %77 : vector<32x64xf32>
    %79 = vector.extract_strided_slice %2 {offsets = [1, 1, 0, 0], sizes = [1, 1, 224, 64], strides = [1, 1, 1, 1]} : vector<2x3x224x64xf32> to vector<1x1x224x64xf32>
    %80 = vector.shape_cast %79 : vector<1x1x224x64xf32> to vector<224x64xf32>
    %cst_30 = arith.constant dense<0.000000e+00> : vector<32x64xf32>
    %81 = tpu.matmul %74, %80, %cst_30 {dimension_numbers = #tpu.dot_dimension_numbers<[1], [0], [0], [1], [0, 0, 1, 1], [], []>} : vector<32x224xf32>, vector<224x64xf32>, vector<32x64xf32> -> vector<32x64xf32>
    %82 = arith.addf %72, %81 : vector<32x64xf32>
    %83 = vector.extract_strided_slice %60 {offsets = [2, 0, 0], sizes = [4, 8, 224], strides = [1, 1, 1]} : vector<7x8x224xf32> to vector<4x8x224xf32>
    %84 = vector.shape_cast %83 : vector<4x8x224xf32> to vector<32x224xf32>
    %85 = vector.extract_strided_slice %2 {offsets = [0, 2, 0, 0], sizes = [1, 1, 224, 64], strides = [1, 1, 1, 1]} : vector<2x3x224x64xf32> to vector<1x1x224x64xf32>
    %86 = vector.shape_cast %85 : vector<1x1x224x64xf32> to vector<224x64xf32>
    %cst_31 = arith.constant dense<0.000000e+00> : vector<32x64xf32>
    %87 = tpu.matmul %84, %86, %cst_31 {dimension_numbers = #tpu.dot_dimension_numbers<[1], [0], [0], [1], [0, 0, 1, 1], [], []>} : vector<32x224xf32>, vector<224x64xf32>, vector<32x64xf32> -> vector<32x64xf32>
    %88 = arith.addf %78, %87 : vector<32x64xf32>
    %89 = vector.extract_strided_slice %2 {offsets = [1, 2, 0, 0], sizes = [1, 1, 224, 64], strides = [1, 1, 1, 1]} : vector<2x3x224x64xf32> to vector<1x1x224x64xf32>
    %90 = vector.shape_cast %89 : vector<1x1x224x64xf32> to vector<224x64xf32>
    %cst_32 = arith.constant dense<0.000000e+00> : vector<32x64xf32>
    %91 = tpu.matmul %84, %90, %cst_32 {dimension_numbers = #tpu.dot_dimension_numbers<[1], [0], [0], [1], [0, 0, 1, 1], [], []>} : vector<32x224xf32>, vector<224x64xf32>, vector<32x64xf32> -> vector<32x64xf32>
    %92 = arith.addf %82, %91 : vector<32x64xf32>
    %93 = vector.shape_cast %88 : vector<32x64xf32> to vector<2x2x8x64xf32>
    %94 = vector.shape_cast %92 : vector<32x64xf32> to vector<2x2x8x64xf32>
    %95 = vector.extract_strided_slice %93 {offsets = [0, 0, 0, 0], sizes = [2, 1, 8, 64], strides = [1, 1, 1, 1]} : vector<2x2x8x64xf32> to vector<2x1x8x64xf32>
    %96 = vector.shape_cast %95 : vector<2x1x8x64xf32> to vector<2x8x64xf32>
    %97 = vector.extract_strided_slice %93 {offsets = [0, 1, 0, 0], sizes = [2, 1, 8, 64], strides = [1, 1, 1, 1]} : vector<2x2x8x64xf32> to vector<2x1x8x64xf32>
    %98 = vector.shape_cast %97 : vector<2x1x8x64xf32> to vector<2x8x64xf32>
    %99 = arith.maximumf %96, %98 : vector<2x8x64xf32>
    %100 = vector.extract_strided_slice %94 {offsets = [0, 0, 0, 0], sizes = [2, 1, 8, 64], strides = [1, 1, 1, 1]} : vector<2x2x8x64xf32> to vector<2x1x8x64xf32>
    %101 = vector.shape_cast %100 : vector<2x1x8x64xf32> to vector<2x8x64xf32>
    %102 = vector.extract_strided_slice %94 {offsets = [0, 1, 0, 0], sizes = [2, 1, 8, 64], strides = [1, 1, 1, 1]} : vector<2x2x8x64xf32> to vector<2x1x8x64xf32>
    %103 = vector.shape_cast %102 : vector<2x1x8x64xf32> to vector<2x8x64xf32>
    %104 = arith.maximumf %101, %103 : vector<2x8x64xf32>
    %105 = arith.maximumf %99, %104 : vector<2x8x64xf32>
    %c0_33 = arith.constant 0 : index
    %c0_34 = arith.constant 0 : index
    %106 = vector.load %arg5[%c0_33, %c0_34] : memref<1x64xf32, #tpu.memory_space<vmem>>, vector<1x64xf32>
    %107 = vector.shape_cast %106 : vector<1x64xf32> to vector<1x1x64xf32>
    %108 = vector.broadcast %107 : vector<1x1x64xf32> to vector<2x8x64xf32>
    %109 = arith.addf %105, %108 : vector<2x8x64xf32>
    %cst_35 = arith.constant 0.000000e+00 : f32
    %110 = vector.broadcast %cst_35 : f32 to vector<2x8x64xf32>
    %111 = arith.cmpf ogt, %109, %110 : vector<2x8x64xf32>
    %cst_36 = arith.constant 0.000000e+00 : f32
    %112 = vector.broadcast %cst_36 : f32 to vector<2x8x64xf32>
    %113 = arith.minimumf %109, %112 : vector<2x8x64xf32>
    %114 = math.exp %113 : vector<2x8x64xf32>
    %cst_37 = arith.constant 1.000000e+00 : f32
    %115 = vector.broadcast %cst_37 : f32 to vector<2x8x64xf32>
    %116 = arith.subf %114, %115 : vector<2x8x64xf32>
    %117 = arith.select %111, %109, %116 : vector<2x8x64xi1>, vector<2x8x64xf32>
    %cst_38 = arith.constant 0.000000e+00 : f32
    %118 = vector.broadcast %cst_38 : f32 to vector<8x4xf32>
    %119 = vector.extract_strided_slice %117 {offsets = [0, 0, 0], sizes = [1, 8, 64], strides = [1, 1, 1]} : vector<2x8x64xf32> to vector<1x8x64xf32>
    %120 = vector.shape_cast %119 : vector<1x8x64xf32> to vector<8x64xf32>
    %121 = vector.extract_strided_slice %3 {offsets = [0, 0, 0], sizes = [1, 64, 4], strides = [1, 1, 1]} : vector<2x64x4xf32> to vector<1x64x4xf32>
    %122 = vector.shape_cast %121 : vector<1x64x4xf32> to vector<64x4xf32>
    %cst_39 = arith.constant dense<0.000000e+00> : vector<8x4xf32>
    %123 = tpu.matmul %120, %122, %cst_39 {dimension_numbers = #tpu.dot_dimension_numbers<[1], [0], [0], [1], [0, 0, 1, 1], [], []>} : vector<8x64xf32>, vector<64x4xf32>, vector<8x4xf32> -> vector<8x4xf32>
    %124 = arith.addf %118, %123 : vector<8x4xf32>
    %125 = vector.extract_strided_slice %117 {offsets = [1, 0, 0], sizes = [1, 8, 64], strides = [1, 1, 1]} : vector<2x8x64xf32> to vector<1x8x64xf32>
    %126 = vector.shape_cast %125 : vector<1x8x64xf32> to vector<8x64xf32>
    %127 = vector.extract_strided_slice %3 {offsets = [1, 0, 0], sizes = [1, 64, 4], strides = [1, 1, 1]} : vector<2x64x4xf32> to vector<1x64x4xf32>
    %128 = vector.shape_cast %127 : vector<1x64x4xf32> to vector<64x4xf32>
    %cst_40 = arith.constant dense<0.000000e+00> : vector<8x4xf32>
    %129 = tpu.matmul %126, %128, %cst_40 {dimension_numbers = #tpu.dot_dimension_numbers<[1], [0], [0], [1], [0, 0, 1, 1], [], []>} : vector<8x64xf32>, vector<64x4xf32>, vector<8x4xf32> -> vector<8x4xf32>
    %130 = arith.addf %124, %129 : vector<8x4xf32>
    %c0_41 = arith.constant 0 : index
    %c0_42 = arith.constant 0 : index
    %131 = vector.load %arg7[%c0_41, %c0_42] : memref<1x4xf32, #tpu.memory_space<vmem>>, vector<1x4xf32>
    %132 = vector.broadcast %131 : vector<1x4xf32> to vector<8x4xf32>
    %133 = arith.addf %130, %132 : vector<8x4xf32>
    %cst_43 = arith.constant 0.000000e+00 : f32
    %134 = vector.broadcast %cst_43 : f32 to vector<8x4xf32>
    %135 = arith.cmpf ogt, %133, %134 : vector<8x4xf32>
    %cst_44 = arith.constant 0.000000e+00 : f32
    %136 = vector.broadcast %cst_44 : f32 to vector<8x4xf32>
    %137 = arith.minimumf %133, %136 : vector<8x4xf32>
    %138 = math.exp %137 : vector<8x4xf32>
    %cst_45 = arith.constant 1.000000e+00 : f32
    %139 = vector.broadcast %cst_45 : f32 to vector<8x4xf32>
    %140 = arith.subf %138, %139 : vector<8x4xf32>
    %141 = arith.select %135, %133, %140 : vector<8x4xi1>, vector<8x4xf32>
    %cst_46 = arith.constant dense<0xFF800000> : vector<8xf32>
    %142 = vector.multi_reduction <maximumf>, %141, %cst_46 [1] : vector<8x4xf32> to vector<8xf32>
    %143 = vector.shape_cast %142 : vector<8xf32> to vector<8x1xf32>
    %144 = vector.broadcast %143 : vector<8x1xf32> to vector<8x4xf32>
    %145 = arith.subf %141, %144 : vector<8x4xf32>
    %146 = math.exp %145 : vector<8x4xf32>
    %cst_47 = arith.constant dense<0.000000e+00> : vector<8xf32>
    %147 = vector.multi_reduction <add>, %146, %cst_47 [1] : vector<8x4xf32> to vector<8xf32>
    %148 = vector.shape_cast %147 : vector<8xf32> to vector<8x1xf32>
    %149 = math.log %148 : vector<8x1xf32>
    %150 = arith.addf %149, %143 : vector<8x1xf32>
    %151 = vector.broadcast %150 : vector<8x1xf32> to vector<8x4xf32>
    %152 = arith.subf %141, %151 : vector<8x4xf32>
    %c0_48 = arith.constant 0 : index
    %c0_49 = arith.constant 0 : index
    %153 = vector.load %arg8[%c0_48, %c0_49] : memref<8x4xf32, #tpu.memory_space<vmem>>, vector<8x4xf32>
    tpu.vector_store %arg8[%c0_48, %c0_49], %152 {strides = array<i32>} : memref<8x4xf32, #tpu.memory_space<vmem>>, vector<8x4xf32>,
    return
  }
  func.func @transform_0(%arg0: i32) -> (i32, i32, i32) {
    %c0_i32 = arith.constant 0 : i32
    %c0_i32_0 = arith.constant 0 : i32
    %c0_i32_1 = arith.constant 0 : i32
    return %c0_i32, %arg0, %c0_i32_0 : i32, i32, i32
  }
  func.func @transform_1(%arg0: i32) -> (i32, i32, i32, i32) {
    %c0_i32 = arith.constant 0 : i32
    %c0_i32_0 = arith.constant 0 : i32
    %c0_i32_1 = arith.constant 0 : i32
    %c0_i32_2 = arith.constant 0 : i32
    %c0_i32_3 = arith.constant 0 : i32
    return %c0_i32, %c0_i32_0, %c0_i32_1, %c0_i32_2 : i32, i32, i32, i32
  }
  func.func @transform_2(%arg0: i32) -> (i32, i32) {
    %c0_i32 = arith.constant 0 : i32
    %c0_i32_0 = arith.constant 0 : i32
    %c0_i32_1 = arith.constant 0 : i32
    return %c0_i32, %c0_i32_0 : i32, i32
  }
  func.func @transform_3(%arg0: i32) -> (i32, i32, i32, i32) {
    %c0_i32 = arith.constant 0 : i32
    %c0_i32_0 = arith.constant 0 : i32
    %c0_i32_1 = arith.constant 0 : i32
    %c0_i32_2 = arith.constant 0 : i32
    %c0_i32_3 = arith.constant 0 : i32
    return %c0_i32, %c0_i32_0, %c0_i32_1, %c0_i32_2 : i32, i32, i32, i32
  }
  func.func @transform_4(%arg0: i32) -> (i32, i32) {
    %c0_i32 = arith.constant 0 : i32
    %c0_i32_0 = arith.constant 0 : i32
    %c0_i32_1 = arith.constant 0 : i32
    return %c0_i32, %c0_i32_0 : i32, i32
  }
  func.func @transform_5(%arg0: i32) -> (i32, i32, i32) {
    %c0_i32 = arith.constant 0 : i32
    %c0_i32_0 = arith.constant 0 : i32
    %c0_i32_1 = arith.constant 0 : i32
    %c0_i32_2 = arith.constant 0 : i32
    return %c0_i32, %c0_i32_0, %c0_i32_1 : i32, i32, i32
  }
  func.func @transform_6(%arg0: i32) -> (i32, i32) {
    %c0_i32 = arith.constant 0 : i32
    %c0_i32_0 = arith.constant 0 : i32
    %c0_i32_1 = arith.constant 0 : i32
    return %c0_i32, %c0_i32_0 : i32, i32
  }
  func.func @transform_7(%arg0: i32) -> (i32, i32) {
    %c0_i32 = arith.constant 0 : i32
    %c0_i32_0 = arith.constant 0 : i32
    return %arg0, %c0_i32 : i32, i32
  }
}

</mosaic_0001>

<bundles_post_ra>
// kernel: tpu_custom_call.1
= control target key start
LH: loop header
LB: loop body
LE: loop exit
PB: predicated region body
PF: predicated region fallthrough
CT: control target
= control target key end

     0   :  { %v3882_v3 = vmov 0.0   ;;  %vm250_vm0 = vcmask 130048   ;;  %vm1349_vm1 = vcmask 785408   ;;  %vm2313_vm14 = vmmov 0   ;;  %s3874_s1 = inlined_call_operand.vmem [shape: f32[2,3,16,224], index: 1, kind: input, shape index: {}]   ;;  %s3875_s0 = inlined_call_operand.vmem [shape: f32[16,8,16], index: 0, kind: input, shape index: {}]   ;;  %s3876_s3 = inlined_call_operand.vmem [shape: f32[2,3,224,64], index: 3, kind: input, shape index: {}]   ;;  %s3877_s2 = inlined_call_operand.vmem [shape: f32[1,224], index: 2, kind: input, shape index: {}]   ;;  %s3878_s5 = inlined_call_operand.vmem [shape: f32[2,64,4], index: 5, kind: input, shape index: {}]   ;;  %s3879_s4 = inlined_call_operand.vmem [shape: f32[1,64], index: 4, kind: input, shape index: {}]   ;;  %s3880_s6 = inlined_call_operand.vmem [shape: f32[1,4], index: 6, kind: input, shape index: {}]   ;;  %s3881_s7 = inlined_call_operand.vmem [shape: f32[8,4], index: 7, kind: output, shape index: {}]  }
   0x1   :  { %v49_v0 = vld [vmem:[%s3874_s1 + $0x38] sm:$0xff]  ;;  %v48_v2 = vld [vmem:[%s3874_s1 + $0x30] sm:$0xff]  ;;  %357 = vmatprep.mubr.f32.mxu0 %v3882_v3  ;;  %505 = vmatprep.mubr.f32.mxu1 %v3882_v3  ;;  %v47_v5 = vld [vmem:[%s3874_s1 + $0x28] sm:$0xff]  ;;  %vm1913_vm15 = vcmask 523264  }
   0x2   :  { %v45_v1 = vld [vmem:[%s3874_s1 + $0x18] sm:$0xff]  ;;  %321 = vmatprep.subr.mxu0 %v49_v0  ;;  %v44_v4 = vld [vmem:[%s3874_s1 + $0x10] sm:$0xff]  ;;  %v43_v6 = vld [vmem:[%s3874_s1 + $0x8] sm:$0xff] }
   0x3   :  { %469 = vmatprep.subr.mxu1 %v45_v1  ;;  %322 = vmatpush1.msra.mxu0 %v48_v2  ;;  %v46_v7 = vld [vmem:[%s3874_s1 + $0x20] sm:$0xff]  ;;  %v2383_v9 = vld [vmem:[%s3875_s0 + $0x8] sm:$0xff]  ;;  %v61_v11 = vld [vmem:[%s3874_s1 + $0x98] sm:$0xff] }
   0x4   :  { %470 = vmatpush1.msra.mxu1 %v44_v4  ;;  %v42_v8 = vld [vmem:[%s3874_s1] sm:$0xff]  ;;  %323 = vmatprep.subr.mxu0 %v47_v5  ;;  %v57_v12 = vld [vmem:[%s3874_s1 + $0x78] sm:$0xff]  ;;  %v60_v13 = vld [vmem:[%s3874_s1 + $0x90] sm:$0xff] }
   0x5   :  { %471 = vmatprep.subr.mxu1 %v43_v6  ;;  %v2388_v10 = vld [vmem:[%s3875_s0] sm:$0xff]  ;;  %324 = vmatpush1.msra.mxu0 %v46_v7  ;;  %v56_v14 = vld [vmem:[%s3874_s1 + $0x70] sm:$0xff]  ;;  %v59_v16 = vld [vmem:[%s3874_s1 + $0x88] sm:$0xff] }
   0x6   :  { %472 = vmatpush1.msra.mxu1 %v42_v8  ;;  %2093 = vmatmul.mubr.msk.f32.vlgmr.msra.gmra.mxu0 %vm250_vm0, %v2383_v9  ;;  %v2409_v15 = vld [vmem:[%s3875_s0 + $0x10] sm:$0xff]  ;;  %v55_v17 = vld [vmem:[%s3874_s1 + $0x68] sm:$0xff]  ;;  %v58_v18 = vld [vmem:[%s3874_s1 + $0x80] sm:$0xff] }
   0x7   :  { %2107 = vmatmul.mubr.msk.f32.vlgmr.msra.gmra.mxu1 %vm250_vm0, %v2388_v10  ;;  %614 = vmatprep.subr.mxu0 %v61_v11  ;;  %v54_v19 = vld [vmem:[%s3874_s1 + $0x60] sm:$0xff]  ;;  %v2434_v20 = vld [vmem:[%s3875_s0 + $0x18] sm:$0xff]  ;;  %v2462_v24 = vld [vmem:[%s3875_s0 + $0x28] sm:$0xff] }
   0x8   :  { %759 = vmatprep.subr.mxu1 %v57_v12  ;;  %615 = vmatpush1.msra.mxu0 %v60_v13  ;;  %v53_v21 = vld [vmem:[%s3874_s1 + $0x58] sm:$0xff]  ;;  %v2451_v23 = vld [vmem:[%s3875_s0 + $0x20] sm:$0xff]  ;;  %v2473_v25 = vld [vmem:[%s3875_s0 + $0x30] sm:$0xff] }
   0x9   :  { %760 = vmatpush1.msra.mxu1 %v56_v14  ;;  %363 = vmatprep.mubr.f32.mxu0 %v3882_v3  ;;  %v65_v22 = vld [vmem:[%s3874_s1 + $0xb8] sm:$0xff]  ;;  %v2495_v27 = vld [vmem:[%s3875_s0 + $0x40] sm:$0xff]  ;;  %v2506_v28 = vld [vmem:[%s3875_s0 + $0x48] sm:$0xff] }
   0xa   :  { %511 = vmatprep.mubr.f32.mxu1 %v3882_v3  ;;  %2094 = vmatmul.mubr.msk.f32.gmra.mxu0 %vm250_vm0, %v2409_v15  ;;  %v2484_v26 = vld [vmem:[%s3875_s0 + $0x38] sm:$0xff]  ;;  %v2517_v29 = vld [vmem:[%s3875_s0 + $0x50] sm:$0xff]  ;;  %v2539_v31 = vld [vmem:[%s3875_s0 + $0x60] sm:$0xff] }
   0xb   :  { %2108 = vmatmul.mubr.msk.f32.gmra.mxu1 %vm250_vm0, %v2383_v9  ;;  %369 = vmatprep.mubr.f32.mxu0 %v3882_v3  ;;  %v2528_v30 = vld [vmem:[%s3875_s0 + $0x58] sm:$0xff]  ;;  %v2550_v32 = vld [vmem:[%s3875_s0 + $0x68] sm:$0xff]  ;;  %v2561_v33 = vld [vmem:[%s3875_s0 + $0x70] sm:$0xff] }
   0xc   :  { %517 = vmatprep.mubr.f32.mxu1 %v3882_v3  ;;  %616 = vmatprep.subr.mxu0 %v59_v16  ;;  %v52_v34 = vld [vmem:[%s3874_s1 + $0x50] sm:$0xff]  ;;  %v51_v36 = vld [vmem:[%s3874_s1 + $0x48] sm:$0xff]  ;;  %v50_v38 = vld [vmem:[%s3874_s1 + $0x40] sm:$0xff] }
   0xd   :  { %761 = vmatprep.subr.mxu1 %v55_v17  ;;  %617 = vmatpush1.msra.mxu0 %v58_v18  ;;  %v64_v35 = vld [vmem:[%s3874_s1 + $0xb0] sm:$0xff]  ;;  %v63_v37 = vld [vmem:[%s3874_s1 + $0xa8] sm:$0xff]  ;;  %v62_v39 = vld [vmem:[%s3874_s1 + $0xa0] sm:$0xff] }
   0xe   :  { %762 = vmatpush1.msra.mxu1 %v54_v19  ;;  %2095 = vmatmul.mubr.msk.f32.gmra.mxu0 %vm250_vm0, %v2434_v20  ;;  %v81_v40 = vld [vmem:[%s3876_s3 + $0x78] sm:$0xff]  ;;  %v80_v41 = vld [vmem:[%s3876_s3 + $0x70] sm:$0xff]  ;;  %v79_v42 = vld [vmem:[%s3876_s3 + $0x68] sm:$0xff] }
   0xf   :  { %2109 = vmatmul.mubr.msk.f32.gmra.mxu1 %vm250_vm0, %v2409_v15  ;;  %375 = vmatprep.mubr.f32.mxu0 %v3882_v3  ;;  %v78_v43 = vld [vmem:[%s3876_s3 + $0x60] sm:$0xff]  ;;  %v109_v44 = vld [vmem:[%s3876_s3 + $0x158] sm:$0xff]  ;;  %v108_v46 = vld [vmem:[%s3876_s3 + $0x150] sm:$0xff] }
  0x10   :  { %523 = vmatprep.mubr.f32.mxu1 %v3882_v3  ;;  %907 = vmatprep.subr.mxu0 %v53_v21  ;;  %v77_v45 = vld [vmem:[%s3876_s3 + $0x58] sm:$0xff]  ;;  %v76_v47 = vld [vmem:[%s3876_s3 + $0x50] sm:$0xff]  ;;  %v107_v48 = vld [vmem:[%s3876_s3 + $0x148] sm:$0xff] }
  0x11   :  { %1076 = vmatprep.subr.mxu1 %v65_v22  ;;  %v75_v49 = vld [vmem:[%s3876_s3 + $0x48] sm:$0xff]  ;;  %v106_v50 = vld [vmem:[%s3876_s3 + $0x140] sm:$0xff]  ;;  %v105_v52 = vld [vmem:[%s3876_s3 + $0x138] sm:$0xff] }
  0x12   :  { %2096 = vmatmul.mubr.msk.f32.gmra.mxu0 %vm250_vm0, %v2451_v23  ;;  %v74_v51 = vld [vmem:[%s3876_s3 + $0x40] sm:$0xff]  ;;  %v73_v53 = vld [vmem:[%s3876_s3 + $0x38] sm:$0xff]  ;;  %v104_v54 = vld [vmem:[%s3876_s3 + $0x130] sm:$0xff] }
  0x13   :  { %2110 = vmatmul.mubr.msk.f32.gmra.mxu1 %vm250_vm0, %v2434_v20  ;;  %381 = vmatprep.mubr.f32.mxu0 %v3882_v3  ;;  %v72_v55 = vld [vmem:[%s3876_s3 + $0x30] sm:$0xff]  ;;  %v103_v56 = vld [vmem:[%s3876_s3 + $0x128] sm:$0xff]  ;;  %v102_v58 = vld [vmem:[%s3876_s3 + $0x120] sm:$0xff] }
  0x14   :  { %529 = vmatprep.mubr.f32.mxu1 %v3882_v3  ;;  %v71_v57 = vld [vmem:[%s3876_s3 + $0x28] sm:$0xff]  ;;  %v70_v59 = vld [vmem:[%s3876_s3 + $0x20] sm:$0xff]  ;;  %v101_v60 = vld [vmem:[%s3876_s3 + $0x118] sm:$0xff] }
  0x15   :  { %v69_v61 = vld [vmem:[%s3876_s3 + $0x18] sm:$0xff]  ;;  %v100_v62 = vld [vmem:[%s3876_s3 + $0x110] sm:$0xff]  ;;  %v99_v0 = vld [vmem:[%s3876_s3 + $0x108] sm:$0xff] }
  0x16   :  { %2097 = vmatmul.mubr.msk.f32.gmra.mxu0 %vm250_vm0, %v2462_v24  ;;  %v68_v63 = vld [vmem:[%s3876_s3 + $0x10] sm:$0xff]  ;;  %v67_v1 = vld [vmem:[%s3876_s3 + $0x8] sm:$0xff]  ;;  %v98_v2 = vld [vmem:[%s3876_s3 + $0x100] sm:$0xff] }
  0x17   :  { %2111 = vmatmul.mubr.msk.f32.gmra.mxu1 %vm250_vm0, %v2451_v23  ;;  %387 = vmatprep.mubr.f32.mxu0 %v3882_v3  ;;  %v66_v4 = vld [vmem:[%s3876_s3] sm:$0xff]  ;;  %v97_v5 = vld [vmem:[%s3876_s3 + $0xf8] sm:$0xff]  ;;  %v96_v7 = vld [vmem:[%s3876_s3 + $0xf0] sm:$0xff] }
  0x18   :  { %535 = vmatprep.mubr.f32.mxu1 %v3882_v3  ;;  %v93_v6 = vld [vmem:[%s3876_s3 + $0xd8] sm:$0xff]  ;;  %v92_v8 = vld [vmem:[%s3876_s3 + $0xd0] sm:$0xff]  ;;  %v95_v12 = vld [vmem:[%s3876_s3 + $0xe8] sm:$0xff] }
  0x19   :  { %v91_v13 = vld [vmem:[%s3876_s3 + $0xc8] sm:$0xff]  ;;  %v94_v17 = vld [vmem:[%s3876_s3 + $0xe0] sm:$0xff]  ;;  %v121_v22 = vld [vmem:[%s3876_s3 + $0x1b8] sm:$0xff] }
  0x1a   :  { %2098 = vmatmul.mubr.msk.f32.gmra.mxu0 %vm250_vm0, %v2473_v25  ;;  %v90_v18 = vld [vmem:[%s3876_s3 + $0xc0] sm:$0xff] }
  0x1b   :  { %2112 = vmatmul.mubr.msk.f32.gmra.mxu1 %vm250_vm0, %v2462_v24  ;;  %393 = vmatprep.mubr.f32.mxu0 %v3882_v3 }
  0x1c   :  { %541 = vmatprep.mubr.f32.mxu1 %v3882_v3 }
  0x1e   :  { %2099 = vmatmul.mubr.msk.f32.gmra.mxu0 %vm250_vm0, %v2484_v26 }
  0x1f   :  { %2113 = vmatmul.mubr.msk.f32.gmra.mxu1 %vm250_vm0, %v2473_v25  ;;  %399 = vmatprep.mubr.f32.mxu0 %v3882_v3 }
  0x20   :  { %547 = vmatprep.mubr.f32.mxu1 %v3882_v3 }
  0x22   :  { %2100 = vmatmul.mubr.msk.f32.gmra.mxu0 %vm250_vm0, %v2495_v27 }
  0x23   :  { %2114 = vmatmul.mubr.msk.f32.gmra.mxu1 %vm250_vm0, %v2484_v26  ;;  %405 = vmatprep.mubr.f32.mxu0 %v3882_v3 }
  0x24   :  { %553 = vmatprep.mubr.f32.mxu1 %v3882_v3 }
  0x26   :  { %2101 = vmatmul.mubr.msk.f32.gmra.mxu0 %vm250_vm0, %v2506_v28 }
  0x27   :  { %2115 = vmatmul.mubr.msk.f32.gmra.mxu1 %vm250_vm0, %v2495_v27  ;;  %411 = vmatprep.mubr.f32.mxu0 %v3882_v3 }
  0x28   :  { %559 = vmatprep.mubr.f32.mxu1 %v3882_v3 }
  0x2a   :  { %2102 = vmatmul.mubr.msk.f32.gmra.mxu0 %vm250_vm0, %v2517_v29 }
  0x2b   :  { %2116 = vmatmul.mubr.msk.f32.gmra.mxu1 %vm250_vm0, %v2506_v28  ;;  %417 = vmatprep.mubr.f32.mxu0 %v3882_v3 }
  0x2c   :  { %565 = vmatprep.mubr.f32.mxu1 %v3882_v3 }
  0x2e   :  { %2103 = vmatmul.mubr.msk.f32.gmra.mxu0 %vm250_vm0, %v2528_v30 }
  0x2f   :  { %2117 = vmatmul.mubr.msk.f32.gmra.mxu1 %vm250_vm0, %v2517_v29  ;;  %423 = vmatprep.mubr.f32.mxu0 %v3882_v3 }
  0x30   :  { %571 = vmatprep.mubr.f32.mxu1 %v3882_v3 }
  0x32   :  { %2104 = vmatmul.mubr.msk.f32.gmra.mxu0 %vm250_vm0, %v2539_v31 }
  0x33   :  { %2118 = vmatmul.mubr.msk.f32.gmra.mxu1 %vm250_vm0, %v2528_v30  ;;  %429 = vmatprep.mubr.f32.mxu0 %v3882_v3 }
  0x34   :  { %577 = vmatprep.mubr.f32.mxu1 %v3882_v3 }
  0x36   :  { %2105 = vmatmul.mubr.msk.f32.gmra.mxu0 %vm250_vm0, %v2550_v32 }
  0x37   :  { %2119 = vmatmul.mubr.msk.f32.gmra.mxu1 %vm250_vm0, %v2539_v31  ;;  %433 = vmatprep.mubr.f32.mxu0 %v3882_v3 }
  0x38   :  { %581 = vmatprep.mubr.f32.mxu1 %v3882_v3 }
  0x3a   :  { %2106 = vmatmul.mubr.msk.f32.gmra.mxu0 %vm250_vm0, %v2561_v33 }
  0x3b   :  { %2120 = vmatmul.mubr.msk.f32.gmra.mxu1 %vm250_vm0, %v2550_v32  ;;  %650 = vmatprep.mubr.f32.mxu0 %v3882_v3 }
  0x3c   :  { %795 = vmatprep.mubr.f32.mxu1 %v3882_v3 }
  0x3e   :  { %2121 = vmatmul.mubr.msk.f32.vlgmr.msra.gmra.mxu0 %vm250_vm0, %v2383_v9 }
  0x3f   :  { %2135 = vmatmul.mubr.msk.f32.vlgmr.msra.gmra.mxu1 %vm250_vm0, %v2388_v10  ;;  %908 = vmatpush1.msra.mxu0 %v52_v34 }
  0x40   :  { %1077 = vmatpush1.msra.mxu1 %v64_v35  ;;  %656 = vmatprep.mubr.f32.mxu0 %v3882_v3 }
  0x41   :  { %801 = vmatprep.mubr.f32.mxu1 %v3882_v3  ;;  %909 = vmatprep.subr.mxu0 %v51_v36 }
  0x42   :  { %1078 = vmatprep.subr.mxu1 %v63_v37  ;;  %2122 = vmatmul.mubr.msk.f32.gmra.mxu0 %vm250_vm0, %v2409_v15  ;;  %v118_v37 = vld [vmem:[%s3876_s3 + $0x1a0] sm:$0xff] }
  0x43   :  { %2136 = vmatmul.mubr.msk.f32.gmra.mxu1 %vm250_vm0, %v2383_v9  ;;  %662 = vmatprep.mubr.f32.mxu0 %v3882_v3 }
  0x44   :  { %807 = vmatprep.mubr.f32.mxu1 %v3882_v3  ;;  %910 = vmatpush1.msra.mxu0 %v50_v38  ;;  %v86_v38 = vld [vmem:[%s3876_s3 + $0xa0] sm:$0xff] }
  0x45   :  { %1079 = vmatpush1.msra.mxu1 %v62_v39  ;;  %1362 = vmatprep.subr.mxu0 %v3882_v3 }
  0x46   :  { %1450 = vmatprep.subr.mxu1 %v3882_v3  ;;  %2123 = vmatmul.mubr.msk.f32.gmra.mxu0 %vm250_vm0, %v2434_v20 }
  0x47   :  { %2137 = vmatmul.mubr.msk.f32.gmra.mxu1 %vm250_vm0, %v2409_v15  ;;  %668 = vmatprep.mubr.f32.mxu0 %v3882_v3 }
  0x48   :  { %813 = vmatprep.mubr.f32.mxu1 %v3882_v3 }
  0x4a   :  { %2124 = vmatmul.mubr.msk.f32.gmra.mxu0 %vm250_vm0, %v2451_v23 }
  0x4b   :  { %2138 = vmatmul.mubr.msk.f32.gmra.mxu1 %vm250_vm0, %v2434_v20  ;;  %674 = vmatprep.mubr.f32.mxu0 %v3882_v3 }
  0x4c   :  { %819 = vmatprep.mubr.f32.mxu1 %v3882_v3 }
  0x4e   :  { %2125 = vmatmul.mubr.msk.f32.gmra.mxu0 %vm250_vm0, %v2462_v24 }
  0x4f   :  { %2139 = vmatmul.mubr.msk.f32.gmra.mxu1 %vm250_vm0, %v2451_v23  ;;  %680 = vmatprep.mubr.f32.mxu0 %v3882_v3 }
  0x50   :  { %825 = vmatprep.mubr.f32.mxu1 %v3882_v3 }
  0x52   :  { %2126 = vmatmul.mubr.msk.f32.gmra.mxu0 %vm250_vm0, %v2473_v25 }
  0x53   :  { %2140 = vmatmul.mubr.msk.f32.gmra.mxu1 %vm250_vm0, %v2462_v24  ;;  %686 = vmatprep.mubr.f32.mxu0 %v3882_v3 }
  0x54   :  { %831 = vmatprep.mubr.f32.mxu1 %v3882_v3 }
  0x56   :  { %2127 = vmatmul.mubr.msk.f32.gmra.mxu0 %vm250_vm0, %v2484_v26 }
  0x57   :  { %2141 = vmatmul.mubr.msk.f32.gmra.mxu1 %vm250_vm0, %v2473_v25  ;;  %692 = vmatprep.mubr.f32.mxu0 %v3882_v3 }
  0x58   :  { %837 = vmatprep.mubr.f32.mxu1 %v3882_v3 }
  0x5a   :  { %2128 = vmatmul.mubr.msk.f32.gmra.mxu0 %vm250_vm0, %v2495_v27 }
  0x5b   :  { %2142 = vmatmul.mubr.msk.f32.gmra.mxu1 %vm250_vm0, %v2484_v26  ;;  %698 = vmatprep.mubr.f32.mxu0 %v3882_v3 }
  0x5c   :  { %843 = vmatprep.mubr.f32.mxu1 %v3882_v3 }
  0x5e   :  { %2129 = vmatmul.mubr.msk.f32.gmra.mxu0 %vm250_vm0, %v2506_v28 }
  0x5f   :  { %2143 = vmatmul.mubr.msk.f32.gmra.mxu1 %vm250_vm0, %v2495_v27  ;;  %704 = vmatprep.mubr.f32.mxu0 %v3882_v3 }
  0x60   :  { %849 = vmatprep.mubr.f32.mxu1 %v3882_v3 }
  0x62   :  { %2130 = vmatmul.mubr.msk.f32.gmra.mxu0 %vm250_vm0, %v2517_v29 }
  0x63   :  { %2144 = vmatmul.mubr.msk.f32.gmra.mxu1 %vm250_vm0, %v2506_v28  ;;  %710 = vmatprep.mubr.f32.mxu0 %v3882_v3 }
  0x64   :  { %855 = vmatprep.mubr.f32.mxu1 %v3882_v3 }
  0x66   :  { %2131 = vmatmul.mubr.msk.f32.gmra.mxu0 %vm250_vm0, %v2528_v30 }
  0x67   :  { %2145 = vmatmul.mubr.msk.f32.gmra.mxu1 %vm250_vm0, %v2517_v29  ;;  %716 = vmatprep.mubr.f32.mxu0 %v3882_v3 }
  0x68   :  { %861 = vmatprep.mubr.f32.mxu1 %v3882_v3 }
  0x6a   :  { %2132 = vmatmul.mubr.msk.f32.gmra.mxu0 %vm250_vm0, %v2539_v31 }
  0x6b   :  { %2146 = vmatmul.mubr.msk.f32.gmra.mxu1 %vm250_vm0, %v2528_v30  ;;  %722 = vmatprep.mubr.f32.mxu0 %v3882_v3 }
  0x6c   :  { %867 = vmatprep.mubr.f32.mxu1 %v3882_v3 }
  0x6e   :  { %2133 = vmatmul.mubr.msk.f32.gmra.mxu0 %vm250_vm0, %v2550_v32 }
  0x6f   :  { %2147 = vmatmul.mubr.msk.f32.gmra.mxu1 %vm250_vm0, %v2539_v31  ;;  %726 = vmatprep.mubr.f32.mxu0 %v3882_v3 }
  0x70   :  { %871 = vmatprep.mubr.f32.mxu1 %v3882_v3 }
  0x72   :  { %2134 = vmatmul.mubr.msk.f32.gmra.mxu0 %vm250_vm0, %v2561_v33 }
  0x73   :  { %2148 = vmatmul.mubr.msk.f32.gmra.mxu1 %vm250_vm0, %v2550_v32  ;;  %943 = vmatprep.mubr.f32.mxu0 %v3882_v3 }
  0x74   :  { %1112 = vmatprep.mubr.f32.mxu1 %v3882_v3 }
  0x76   :  { %2149 = vmatmul.mubr.msk.f32.vlgmr.msra.gmra.mxu0 %vm250_vm0, %v2409_v15 }
  0x77   :  { %2163 = vmatmul.mubr.msk.f32.vlgmr.msra.gmra.mxu1 %vm250_vm0, %v2409_v15  ;;  %949 = vmatprep.mubr.f32.mxu0 %v3882_v3 }
  0x78   :  { %1118 = vmatprep.mubr.f32.mxu1 %v3882_v3  ;;  %1451 = vmatpush1.msra.mxu1 %v81_v40 }
  0x79   :  { %1452 = vmatprep.subr.mxu1 %v3882_v3  ;;  %1363 = vmatpush1.msra.mxu0 %v109_v44 }
  0x7a   :  { %2150 = vmatmul.mubr.msk.f32.gmra.mxu0 %vm250_vm0, %v2434_v20  ;;  %1453 = vmatpush1.msra.mxu1 %v80_v41 }
  0x7b   :  { %2164 = vmatmul.mubr.msk.f32.gmra.mxu1 %vm250_vm0, %v2434_v20  ;;  %955 = vmatprep.mubr.f32.mxu0 %v3882_v3 }
  0x7c   :  { %1124 = vmatprep.mubr.f32.mxu1 %v3882_v3  ;;  %1454 = vmatprep.subr.mxu1 %v3882_v3 }
  0x7d   :  { %1455 = vmatpush1.msra.mxu1 %v79_v42  ;;  %1364 = vmatprep.subr.mxu0 %v3882_v3  ;;  %v117_v42 = vld [vmem:[%s3876_s3 + $0x198] sm:$0xff] }
  0x7e   :  { %2151 = vmatmul.mubr.msk.f32.gmra.mxu0 %vm250_vm0, %v2451_v23  ;;  %1456 = vmatprep.subr.mxu1 %v3882_v3 }
  0x7f   :  { %2165 = vmatmul.mubr.msk.f32.gmra.mxu1 %vm250_vm0, %v2451_v23  ;;  %961 = vmatprep.mubr.f32.mxu0 %v3882_v3  ;;  %v89_v23 = vld [vmem:[%s3876_s3 + $0xb8] sm:$0xff] }
  0x80   :  { %1130 = vmatprep.mubr.f32.mxu1 %v3882_v3  ;;  %1457 = vmatpush1.msra.mxu1 %v78_v43  ;;  %v85_v43 = vld [vmem:[%s3876_s3 + $0x98] sm:$0xff] }
  0x81   :  { %1458 = vmatprep.subr.mxu1 %v3882_v3  ;;  %1365 = vmatpush1.msra.mxu0 %v108_v46 }
  0x82   :  { %2152 = vmatmul.mubr.msk.f32.gmra.mxu0 %vm250_vm0, %v2462_v24  ;;  %1459 = vmatpush1.msra.mxu1 %v77_v45 }
  0x83   :  { %2166 = vmatmul.mubr.msk.f32.gmra.mxu1 %vm250_vm0, %v2462_v24  ;;  %967 = vmatprep.mubr.f32.mxu0 %v3882_v3 }
  0x84   :  { %1136 = vmatprep.mubr.f32.mxu1 %v3882_v3  ;;  %1460 = vmatprep.subr.mxu1 %v3882_v3 }
  0x85   :  { %1461 = vmatpush1.msra.mxu1 %v76_v47  ;;  %1366 = vmatprep.subr.mxu0 %v3882_v3  ;;  %v116_v47 = vld [vmem:[%s3876_s3 + $0x190] sm:$0xff] }
  0x86   :  { %2153 = vmatmul.mubr.msk.f32.gmra.mxu0 %vm250_vm0, %v2473_v25  ;;  %1462 = vmatprep.subr.mxu1 %v3882_v3 }
  0x87   :  { %2167 = vmatmul.mubr.msk.f32.gmra.mxu1 %vm250_vm0, %v2473_v25  ;;  %973 = vmatprep.mubr.f32.mxu0 %v3882_v3 }
  0x88   :  { %1142 = vmatprep.mubr.f32.mxu1 %v3882_v3  ;;  %1367 = vmatpush1.msra.mxu0 %v107_v48  ;;  %v84_v48 = vld [vmem:[%s3876_s3 + $0x90] sm:$0xff] }
  0x89   :  { %1463 = vmatpush1.msra.mxu1 %v75_v49  ;;  %1368 = vmatprep.subr.mxu0 %v3882_v3 }
  0x8a   :  { %2154 = vmatmul.mubr.msk.f32.gmra.mxu0 %vm250_vm0, %v2484_v26  ;;  %1464 = vmatprep.subr.mxu1 %v3882_v3 }
  0x8b   :  { %2168 = vmatmul.mubr.msk.f32.gmra.mxu1 %vm250_vm0, %v2484_v26  ;;  %979 = vmatprep.mubr.f32.mxu0 %v3882_v3 }
  0x8c   :  { %1148 = vmatprep.mubr.f32.mxu1 %v3882_v3  ;;  %1369 = vmatpush1.msra.mxu0 %v106_v50 }
  0x8d   :  { %1465 = vmatpush1.msra.mxu1 %v74_v51  ;;  %1370 = vmatprep.subr.mxu0 %v3882_v3 }
  0x8e   :  { %2155 = vmatmul.mubr.msk.f32.gmra.mxu0 %vm250_vm0, %v2495_v27  ;;  %1466 = vmatprep.subr.mxu1 %v3882_v3 }
  0x8f   :  { %2169 = vmatmul.mubr.msk.f32.gmra.mxu1 %vm250_vm0, %v2495_v27  ;;  %985 = vmatprep.mubr.f32.mxu0 %v3882_v3  ;;  %v120_v27 = vld [vmem:[%s3876_s3 + $0x1b0] sm:$0xff] }
  0x90   :  { %1154 = vmatprep.mubr.f32.mxu1 %v3882_v3  ;;  %1371 = vmatpush1.msra.mxu0 %v105_v52  ;;  %v41_v52 = vld [vmem:[%s3875_s0 + $0x78] sm:$0xff] }
  0x91   :  { %1467 = vmatpush1.msra.mxu1 %v73_v53  ;;  %1372 = vmatprep.subr.mxu0 %v3882_v3  ;;  %v115_v53 = vld [vmem:[%s3876_s3 + $0x188] sm:$0xff] }
  0x92   :  { %2156 = vmatmul.mubr.msk.f32.gmra.mxu0 %vm250_vm0, %v2506_v28  ;;  %1468 = vmatprep.subr.mxu1 %v3882_v3 }
  0x93   :  { %2170 = vmatmul.mubr.msk.f32.gmra.mxu1 %vm250_vm0, %v2506_v28  ;;  %991 = vmatprep.mubr.f32.mxu0 %v3882_v3  ;;  %v88_v28 = vld [vmem:[%s3876_s3 + $0xb0] sm:$0xff] }
  0x94   :  { %1160 = vmatprep.mubr.f32.mxu1 %v3882_v3  ;;  %1373 = vmatpush1.msra.mxu0 %v104_v54  ;;  %v83_v54 = vld [vmem:[%s3876_s3 + $0x88] sm:$0xff] }
  0x95   :  { %1469 = vmatpush1.msra.mxu1 %v72_v55  ;;  %1374 = vmatprep.subr.mxu0 %v3882_v3 }
  0x96   :  { %2157 = vmatmul.mubr.msk.f32.gmra.mxu0 %vm250_vm0, %v2517_v29  ;;  %1470 = vmatprep.subr.mxu1 %v3882_v3 }
  0x97   :  { %2171 = vmatmul.mubr.msk.f32.gmra.mxu1 %vm250_vm0, %v2517_v29  ;;  %997 = vmatprep.mubr.f32.mxu0 %v3882_v3 }
  0x98   :  { %1166 = vmatprep.mubr.f32.mxu1 %v3882_v3  ;;  %1375 = vmatpush1.msra.mxu0 %v103_v56 }
  0x99   :  { %1471 = vmatpush1.msra.mxu1 %v71_v57  ;;  %1376 = vmatprep.subr.mxu0 %v3882_v3 }
  0x9a   :  { %2158 = vmatmul.mubr.msk.f32.gmra.mxu0 %vm250_vm0, %v2528_v30  ;;  %1472 = vmatprep.subr.mxu1 %v3882_v3 }
  0x9b   :  { %2172 = vmatmul.mubr.msk.f32.gmra.mxu1 %vm250_vm0, %v2528_v30  ;;  %1003 = vmatprep.mubr.f32.mxu0 %v3882_v3 }
  0x9c   :  { %1172 = vmatprep.mubr.f32.mxu1 %v3882_v3  ;;  %1377 = vmatpush1.msra.mxu0 %v102_v58  ;;  %v114_v58 = vld [vmem:[%s3876_s3 + $0x180] sm:$0xff] }
  0x9d   :  { %1473 = vmatpush1.msra.mxu1 %v70_v59  ;;  %1378 = vmatprep.subr.mxu0 %v3882_v3  ;;  %v82_v59 = vld [vmem:[%s3876_s3 + $0x80] sm:$0xff] }
  0x9e   :  { %2159 = vmatmul.mubr.msk.f32.gmra.mxu0 %vm250_vm0, %v2539_v31  ;;  %1474 = vmatprep.subr.mxu1 %v3882_v3 }
  0x9f   :  { %2173 = vmatmul.mubr.msk.f32.gmra.mxu1 %vm250_vm0, %v2539_v31  ;;  %1009 = vmatprep.mubr.f32.mxu0 %v3882_v3 }
  0xa0   :  { %1178 = vmatprep.mubr.f32.mxu1 %v3882_v3  ;;  %1379 = vmatpush1.msra.mxu0 %v101_v60 }
  0xa1   :  { %1475 = vmatpush1.msra.mxu1 %v69_v61  ;;  %1380 = vmatprep.subr.mxu0 %v3882_v3 }
  0xa2   :  { %2160 = vmatmul.mubr.msk.f32.gmra.mxu0 %vm250_vm0, %v2550_v32  ;;  %1476 = vmatprep.subr.mxu1 %v3882_v3 }
  0xa3   :  { %2174 = vmatmul.mubr.msk.f32.gmra.mxu1 %vm250_vm0, %v2550_v32  ;;  %1015 = vmatprep.mubr.f32.mxu0 %v3882_v3  ;;  %v119_v32 = vld [vmem:[%s3876_s3 + $0x1a8] sm:$0xff] }
  0xa4   :  { %1184 = vmatprep.mubr.f32.mxu1 %v3882_v3  ;;  %1381 = vmatpush1.msra.mxu0 %v100_v62 }
  0xa5   :  { %1477 = vmatpush1.msra.mxu1 %v68_v63  ;;  %1382 = vmatprep.subr.mxu0 %v3882_v3  ;;  %v113_v63 = vld [vmem:[%s3876_s3 + $0x178] sm:$0xff] }
  0xa6   :  { %2161 = vmatmul.mubr.msk.f32.gmra.mxu0 %vm250_vm0, %v2561_v33  ;;  %1478 = vmatprep.subr.mxu1 %v3882_v3 }
  0xa7   :  { %2175 = vmatmul.mubr.msk.f32.gmra.mxu1 %vm250_vm0, %v2561_v33  ;;  %1019 = vmatprep.mubr.f32.mxu0 %v3882_v3  ;;  %v87_v33 = vld [vmem:[%s3876_s3 + $0xa8] sm:$0xff] }
  0xa8   :  { %1188 = vmatprep.mubr.f32.mxu1 %v3882_v3  ;;  %1383 = vmatpush1.msra.mxu0 %v99_v0 }
  0xa9   :  { %1479 = vmatpush1.msra.mxu1 %v67_v1  ;;  %1384 = vmatprep.subr.mxu0 %v3882_v3 }
  0xaa   :  { %1480 = vmatprep.subr.mxu1 %v3882_v3  ;;  %1385 = vmatpush1.msra.mxu0 %v98_v2 }
  0xab   :  { %1481 = vmatpush1.msra.mxu1 %v66_v4  ;;  %1386 = vmatprep.subr.mxu0 %v3882_v3 }
  0xac   :  { %1490 = vmatprep.subr.mxu1 %v3882_v3  ;;  %1387 = vmatpush1.msra.mxu0 %v97_v5 }
  0xad   :  { %1491 = vmatpush2.msra.mxu1 %v93_v6  ;;  %1388 = vmatprep.subr.mxu0 %v3882_v3  ;;  %v112_v6 = vld [vmem:[%s3876_s3 + $0x170] sm:$0xff] }
  0xae   :  { %1492 = vmatprep.subr.mxu1 %v3882_v3  ;;  %1389 = vmatpush1.msra.mxu0 %v96_v7 }
  0xaf   :  { %1493 = vmatpush2.msra.mxu1 %v92_v8  ;;  %1390 = vmatprep.subr.mxu0 %v3882_v3 }
  0xb0   :  { %1494 = vmatprep.subr.mxu1 %v3882_v3  ;;  %1391 = vmatpush1.msra.mxu0 %v95_v12 }
  0xb1   :  { %1495 = vmatpush2.msra.mxu1 %v91_v13  ;;  %1392 = vmatprep.subr.mxu0 %v3882_v3 }
  0xb2   :  { %1496 = vmatprep.subr.mxu1 %v3882_v3  ;;  %1393 = vmatpush1.msra.mxu0 %v94_v17 }
  0xb3   :  { %1497 = vmatpush2.msra.mxu1 %v90_v18  ;;  %1402 = vmatprep.subr.mxu0 %v3882_v3 }
  0xb4   :  { %1498 = vmatprep.subr.mxu1 %v3882_v3  ;;  %1403 = vmatpush2.msra.mxu0 %v121_v22 }
  0xb5   :  { %1499 = vmatpush2.msra.mxu1 %v89_v23  ;;  %1404 = vmatprep.subr.mxu0 %v3882_v3 }
  0xb6   :  { %1500 = vmatprep.subr.mxu1 %v3882_v3  ;;  %1405 = vmatpush2.msra.mxu0 %v120_v27 }
  0xb7   :  { %1501 = vmatpush2.msra.mxu1 %v88_v28  ;;  %1406 = vmatprep.subr.mxu0 %v3882_v3 }
  0xb8   :  { %1502 = vmatprep.subr.mxu1 %v3882_v3  ;;  %1407 = vmatpush2.msra.mxu0 %v119_v32 }
  0xb9   :  { %1503 = vmatpush2.msra.mxu1 %v87_v33  ;;  %1408 = vmatprep.subr.mxu0 %v3882_v3 }
  0xba   :  { %1504 = vmatprep.subr.mxu1 %v3882_v3  ;;  %1409 = vmatpush2.msra.mxu0 %v118_v37 }
  0xbb   :  { %1505 = vmatpush2.msra.mxu1 %v86_v38  ;;  %1410 = vmatprep.subr.mxu0 %v3882_v3 }
  0xbc   :  { %1506 = vmatprep.subr.mxu1 %v3882_v3  ;;  %1411 = vmatpush2.msra.mxu0 %v117_v42 }
  0xbd   :  { %1507 = vmatpush2.msra.mxu1 %v85_v43  ;;  %1412 = vmatprep.subr.mxu0 %v3882_v3 }
  0xbe   :  { %1508 = vmatprep.subr.mxu1 %v3882_v3  ;;  %1413 = vmatpush2.msra.mxu0 %v116_v47 }
  0xbf   :  { %1509 = vmatpush2.msra.mxu1 %v84_v48  ;;  %1414 = vmatprep.subr.mxu0 %v3882_v3 }
  0xc0   :  { %1510 = vmatprep.subr.mxu1 %v3882_v3  ;;  %2176 = vmatmul.mubr.msk.f32.gmra.mxu1 %vm250_vm0, %v41_v52 }
  0xc1   :  { %1415 = vmatpush2.msra.mxu0 %v115_v53  ;;  %1511 = vmatpush2.msra.mxu1 %v83_v54 }
  0xc2   :  { %1416 = vmatprep.subr.mxu0 %v3882_v3  ;;  %1512 = vmatprep.subr.mxu1 %v3882_v3 }
  0xc3   :  { %1417 = vmatpush2.msra.mxu0 %v114_v58  ;;  %1513 = vmatpush2.msra.mxu1 %v82_v59 }
  0xc4   :  { %1418 = vmatprep.subr.mxu0 %v3882_v3  ;;  %1620 = vmatprep.subr.mxu1 %v3882_v3 }
  0xc5   :  { %1419 = vmatpush2.msra.mxu0 %v113_v63 }
  0xc6   :  { %v359_v9 = vpop.f32.mrf.mxu0  ;;  %1420 = vmatprep.subr.mxu0 %v3882_v3  ;;  %2162 = vmatmul.mubr.msk.f32.gmra.mxu0 %vm250_vm0, %v41_v52 }
  0xc7   :  { %v507_v10 = vpop.f32.mrf.mxu1  ;;  %1421 = vmatpush2.msra.mxu0 %v112_v6 }
  0xc8   :  { %v2877_v11 = vadd.f32 %v507_v10, %v359_v9  ;;  %v361_v14 = vpop.f32.mrf.mxu0  ;;  %1422 = vmatprep.subr.mxu0 %v3882_v3  ;;  %v111_v10 = vld [vmem:[%s3876_s3 + $0x168] sm:$0xff] }
  0xc9   :  { %v509_v15 = vpop.f32.mrf.mxu1  ;;  %1423 = vmatpush2.msra.mxu0 %v111_v10 }
  0xca   :  { %v2887_v16 = vadd.f32 %v509_v15, %v361_v14  ;;  %v365_v19 = vpop.f32.mrf.mxu0  ;;  %1424 = vmatprep.subr.mxu0 %v3882_v3  ;;  %v110_v15 = vld [vmem:[%s3876_s3 + $0x160] sm:$0xff] }
  0xcb   :  { %v513_v20 = vpop.f32.mrf.mxu1  ;;  %1425 = vmatpush2.msra.mxu0 %v110_v15 }
  0xcc   :  { %v2897_v21 = vadd.f32 %v513_v20, %v365_v19  ;;  %v367_v24 = vpop.f32.mrf.mxu0  ;;  %1535 = vmatprep.subr.mxu0 %v3882_v3 }
  0xcd   :  { %v515_v25 = vpop.f32.mrf.mxu1 }
  0xce   :  { %v2907_v26 = vadd.f32 %v515_v25, %v367_v24  ;;  %v371_v29 = vpop.f32.mrf.mxu0 }
  0xcf   :  { %v519_v30 = vpop.f32.mrf.mxu1 }
  0xd0   :  { %v2917_v31 = vadd.f32 %v519_v30, %v371_v29  ;;  %v373_v34 = vpop.f32.mrf.mxu0 }
  0xd1   :  { %v521_v35 = vpop.f32.mrf.mxu1 }
  0xd2   :  { %v2927_v36 = vadd.f32 %v521_v35, %v373_v34  ;;  %v377_v39 = vpop.f32.mrf.mxu0 }
  0xd3   :  { %v525_v40 = vpop.f32.mrf.mxu1 }
  0xd4   :  { %v2937_v41 = vadd.f32 %v525_v40, %v377_v39  ;;  %v379_v44 = vpop.f32.mrf.mxu0 }
  0xd5   :  { %v527_v45 = vpop.f32.mrf.mxu1 }
  0xd6   :  { %v2947_v46 = vadd.f32 %v527_v45, %v379_v44  ;;  %v383_v49 = vpop.f32.mrf.mxu0 }
  0xd7   :  { %v531_v50 = vpop.f32.mrf.mxu1 }
  0xd8   :  { %v2957_v51 = vadd.f32 %v531_v50, %v383_v49  ;;  %v385_v55 = vpop.f32.mrf.mxu0 }
  0xd9   :  { %v533_v56 = vpop.f32.mrf.mxu1 }
  0xda   :  { %v2971_v57 = vadd.f32 %v533_v56, %v385_v55  ;;  %v389_v60 = vpop.f32.mrf.mxu0 }
  0xdb   :  { %v537_v61 = vpop.f32.mrf.mxu1 }
  0xdc   :  { %v2981_v62 = vadd.f32 %v537_v61, %v389_v60  ;;  %v391_v0 = vpop.f32.mrf.mxu0 }
  0xdd   :  { %v539_v1 = vpop.f32.mrf.mxu1 }
  0xde   :  { %v2988_v2 = vadd.f32 %v539_v1, %v391_v0  ;;  %v395_v4 = vpop.f32.mrf.mxu0 }
  0xdf   :  { %v543_v5 = vpop.f32.mrf.mxu1 }
  0xe0   :  { %v2995_v7 = vadd.f32 %v543_v5, %v395_v4  ;;  %v397_v8 = vpop.f32.mrf.mxu0 }
  0xe1   :  { %v545_v9 = vpop.f32.mrf.mxu1 }
  0xe2   :  { %v3001_v12 = vadd.f32 %v545_v9, %v397_v8  ;;  %v401_v13 = vpop.f32.mrf.mxu0 }
  0xe3   :  { %v549_v14 = vpop.f32.mrf.mxu1 }
  0xe4   :  { %3884 = vst [vmem:[#allocation2_spill] sm:$0xff] %v3001_v12  ;;  %v3007_v17 = vadd.f32 %v549_v14, %v401_v13  ;;  %v403_v18 = vpop.f32.mrf.mxu0 }
  0xe5   :  { %v551_v19 = vpop.f32.mrf.mxu1 }
  0xe6   :  { %v3010_v20 = vadd.f32 %v551_v19, %v403_v18  ;;  %v407_v22 = vpop.f32.mrf.mxu0 }
  0xe7   :  { %v555_v23 = vpop.f32.mrf.mxu1 }
  0xe8   :  { %3885 = vst [vmem:[#allocation3_spill] sm:$0xff] %v3010_v20  ;;  %v3012_v24 = vadd.f32 %v555_v23, %v407_v22  ;;  %v409_v25 = vpop.f32.mrf.mxu0 }
  0xe9   :  { %v557_v27 = vpop.f32.mrf.mxu1 }
  0xea   :  { %3886 = vst [vmem:[#allocation4_spill] sm:$0xff] %v3012_v24  ;;  %v3014_v28 = vadd.f32 %v557_v27, %v409_v25  ;;  %v413_v29 = vpop.f32.mrf.mxu0 }
  0xeb   :  { %v561_v30 = vpop.f32.mrf.mxu1 }
  0xec   :  { %3887 = vst [vmem:[#allocation5_spill] sm:$0xff] %v3014_v28  ;;  %v3016_v32 = vadd.f32 %v561_v30, %v413_v29  ;;  %v415_v33 = vpop.f32.mrf.mxu0 }
  0xed   :  { %v563_v34 = vpop.f32.mrf.mxu1 }
  0xee   :  { %3888 = vst [vmem:[#allocation6_spill] sm:$0xff] %v3016_v32  ;;  %v3018_v35 = vadd.f32 %v563_v34, %v415_v33  ;;  %v419_v37 = vpop.f32.mrf.mxu0 }
  0xef   :  { %v567_v38 = vpop.f32.mrf.mxu1 }
  0xf0   :  { %3889 = vst [vmem:[#allocation7_spill] sm:$0xff] %v3018_v35  ;;  %v3020_v39 = vadd.f32 %v567_v38, %v419_v37  ;;  %v421_v40 = vpop.f32.mrf.mxu0 }
  0xf1   :  { %v569_v42 = vpop.f32.mrf.mxu1 }
  0xf2   :  { %3890 = vst [vmem:[#allocation8_spill] sm:$0xff] %v3020_v39  ;;  %v3022_v43 = vadd.f32 %v569_v42, %v421_v40  ;;  %v425_v44 = vpop.f32.mrf.mxu0 }
  0xf3   :  { %v573_v45 = vpop.f32.mrf.mxu1 }
  0xf4   :  { %3891 = vst [vmem:[#allocation9_spill] sm:$0xff] %v3022_v43  ;;  %v3024_v47 = vadd.f32 %v573_v45, %v425_v44  ;;  %v427_v48 = vpop.f32.mrf.mxu0 }
  0xf5   :  { %v575_v49 = vpop.f32.mrf.mxu1 }
  0xf6   :  { %3892 = vst [vmem:[#allocation10_spill] sm:$0xff] %v3024_v47  ;;  %v3026_v50 = vadd.f32 %v575_v49, %v427_v48  ;;  %v431_v52 = vpop.f32.mrf.mxu0 }
  0xf7   :  { %v579_v53 = vpop.f32.mrf.mxu1 }
  0xf8   :  { %3893 = vst [vmem:[#allocation11_spill] sm:$0xff] %v3026_v50  ;;  %v432_v54 = vpop.f32.mrf.mxu0 }
  0xf9   :  { %v580_v55 = vpop.f32.mrf.mxu1 }
  0xfa   :  { %v435_v56 = vpop.f32.mrf.mxu0 }
  0xfb   :  { %v583_v58 = vpop.f32.mrf.mxu1 }
  0xfc   :  { %v436_v59 = vpop.f32.mrf.mxu0 }
  0xfd   :  { %v584_v60 = vpop.f32.mrf.mxu1 }
  0xfe   :  { %v3028_v61 = vpop.f32.mrf.mxu0 }
  0xff   :  { %v3030_v63 = vpop.f32.mrf.mxu1 }
 0x100   :  { %v3032_v0 = vpop.f32.mrf.mxu0 }
 0x101   :  { %v3034_v1 = vpop.f32.mrf.mxu1 }
 0x102   :  { %v3036_v4 = vpop.f32.mrf.mxu0 }
 0x103   :  { %v3038_v5 = vpop.f32.mrf.mxu1 }
 0x104   :  { %v3040_v6 = vpop.f32.mrf.mxu0 }
 0x105   :  { %v3042_v8 = vpop.f32.mrf.mxu1 }
 0x106   :  { %v3044_v9 = vpop.f32.mrf.mxu0 }
 0x107   :  { %v3046_v10 = vpop.f32.mrf.mxu1 }
 0x108   :  { %v3048_v13 = vpop.f32.mrf.mxu0 }
 0x109   :  { %v3050_v14 = vpop.f32.mrf.mxu1 }
 0x10a   :  { %v3052_v15 = vpop.f32.mrf.mxu0 }
 0x10b   :  { %v3054_v18 = vpop.f32.mrf.mxu1 }
 0x10c   :  { %v3056_v19 = vpop.f32.mrf.mxu0 }
 0x10d   :  { %v3058_v22 = vpop.f32.mrf.mxu1 }
 0x10e   :  { %v676_v23 = vpop.f32.mrf.mxu0 }
 0x10f   :  { %v821_v25 = vpop.f32.mrf.mxu1 }
 0x110   :  { %v3060_v27 = vadd.f32 %v821_v25, %v676_v23  ;;  %v3062_v29 = vpop.f32.mrf.mxu0 }
 0x111   :  { %v3064_v30 = vpop.f32.mrf.mxu1 }
 0x112   :  { %v3066_v33 = vpop.f32.mrf.mxu0 }
 0x113   :  { %v3068_v34 = vpop.f32.mrf.mxu1 }
 0x114   :  { %v3070_v37 = vpop.f32.mrf.mxu0 }
 0x115   :  { %v3072_v38 = vpop.f32.mrf.mxu1 }
 0x116   :  { %v688_v40 = vpop.f32.mrf.mxu0 }
 0x117   :  { %v833_v42 = vpop.f32.mrf.mxu1 }
 0x118   :  { %v3074_v44 = vadd.f32 %v833_v42, %v688_v40  ;;  %v3076_v45 = vpop.f32.mrf.mxu0 }
 0x119   :  { %v3078_v48 = vpop.f32.mrf.mxu1 }
 0x11a   :  { %v3080_v49 = vpop.f32.mrf.mxu0 }
 0x11b   :  { %v3082_v52 = vpop.f32.mrf.mxu1 }
 0x11c   :  { %v3084_v53 = vpop.f32.mrf.mxu0 }
 0x11d   :  { %v3086_v54 = vpop.f32.mrf.mxu1 }
 0x11e   :  { %3894 = vst [vmem:[#allocation12_spill] sm:$0xff] %v3086_v54  ;;  %v700_v55 = vpop.f32.mrf.mxu0 }
 0x11f   :  { %v845_v56 = vpop.f32.mrf.mxu1 }
 0x120   :  { %v3088_v58 = vadd.f32 %v845_v56, %v700_v55  ;;  %v702_v59 = vpop.f32.mrf.mxu0 }
 0x121   :  { %v847_v60 = vpop.f32.mrf.mxu1 }
 0x122   :  { %3895 = vst [vmem:[#allocation13_spill] sm:$0xff] %v3088_v58  ;;  %v3090_v23 = vadd.f32 %v847_v60, %v702_v59  ;;  %v706_v25 = vpop.f32.mrf.mxu0  ;;  %v1255_v58 = vlaneseq }
 0x123   :  { %v851_v40 = vpop.f32.mrf.mxu1 }
 0x124   :  { %3896 = vst [vmem:[#allocation14_spill] sm:$0xff] %v3090_v23  ;;  %v3092_v42 = vadd.f32 %v851_v40, %v706_v25  ;;  %v3094_v3 = vpop.f32.mrf.mxu0  ;;  %v1256_v20 = vshrl.u32 %v1255_v58, 7 }
 0x125   :  { %3898 = vst [vmem:[#allocation16_spill] sm:$0xff] %v3094_v3  ;;  %v3096_v50 = vpop.f32.mrf.mxu1 }
 0x126   :  { %3897 = vst [vmem:[#allocation15_spill] sm:$0xff] %v3092_v42  ;;  %3899 = vst [vmem:[#allocation17_spill] sm:$0xff] %v3096_v50  ;;  %v712_v47 = vpop.f32.mrf.mxu0 }
 0x127   :  { %v857_v43 = vpop.f32.mrf.mxu1 }
 0x128   :  { %v3098_v39 = vadd.f32 %v857_v43, %v712_v47  ;;  %v714_v35 = vpop.f32.mrf.mxu0 }
 0x129   :  { %v859_v28 = vpop.f32.mrf.mxu1 }
 0x12a   :  { %3900 = vst [vmem:[#allocation18_spill] sm:$0xff] %v3098_v39  ;;  %v3100_v55 = vadd.f32 %v859_v28, %v714_v35  ;;  %v718_v56 = vpop.f32.mrf.mxu0 }
 0x12b   :  { %v863_v32 = vpop.f32.mrf.mxu1 }
 0x12c   :  { %3901 = vst [vmem:[#allocation19_spill] sm:$0xff] %v3100_v55  ;;  %v3102_v59 = vadd.f32 %v863_v32, %v718_v56  ;;  %v720_v60 = vpop.f32.mrf.mxu0  ;;  %v1257_v32 = vsub.s32 0, %v1256_v20  ;;  %v798_v56 = vadd.f32 %v3030_v63, %v3028_v61 }
 0x12d   :  { %v865_v23 = vpop.f32.mrf.mxu1 }
 0x12e   :  { %3902 = vst [vmem:[#allocation20_spill] sm:$0xff] %v3102_v59  ;;  %v3104_v25 = vadd.f32 %v865_v23, %v720_v60  ;;  %v724_v40 = vpop.f32.mrf.mxu0  ;;  %v804_v23 = vadd.f32 %v3038_v5, %v3036_v4 }
 0x12f   :  { %v869_v3 = vpop.f32.mrf.mxu1 }
 0x130   :  { %3903 = vst [vmem:[#allocation21_spill] sm:$0xff] %v3104_v25  ;;  %v725_v42 = vpop.f32.mrf.mxu0  ;;  %v1253_v3 = vld [vmem:[%s3877_s2] sm:$0x3] }
 0x131   :  { %v870_v50 = vpop.f32.mrf.mxu1  ;;  %v1261_v42 = vsub.s32 1, %v1256_v20 }
 0x132   :  { %v728_v24 = vpop.f32.mrf.mxu0 }
 0x133   :  { %v873_v43 = vpop.f32.mrf.mxu1  ;;  %v800_v24 = vadd.f32 %v3034_v1, %v3032_v0 }
 0x134   :  { %v729_v47 = vpop.f32.mrf.mxu0  ;;  %v3120_v43 = vrot.slane %v1253_v3, %v1257_v32 }
 0x135   :  { %v874_v39 = vpop.f32.mrf.mxu1 }
 0x136   :  { %v945_v28 = vpop.f32.mrf.mxu0  ;;  %v806_v39 = vadd.f32 %v3042_v8, %v3040_v6 }
 0x137   :  { %v1114_v35 = vpop.f32.mrf.mxu1  ;;  %v1024_v60 = vadd.f32 %v945_v28, %v2877_v11 }
 0x138   :  { %v947_v55 = vpop.f32.mrf.mxu0  ;;  %v1193_v40 = vadd.f32 %v1114_v35, %v798_v56  ;;  %v3123_v35 = vrot.slane %v1253_v3, %v1261_v42 }
 0x139   :  { %v1116_v12 = vpop.f32.mrf.mxu1  ;;  %v1025_v4 = vadd.f32 %v947_v55, %v2887_v16  ;;  %v810_v16 = vadd.f32 %v3046_v10, %v3044_v9  ;;  %v816_v55 = vadd.f32 %v3054_v18, %v3052_v15  ;;  %v812_v15 = vadd.f32 %v3050_v14, %v3048_v13 }
 0x13a   :  { %v951_v50 = vpop.f32.mrf.mxu0  ;;  %v1194_v5 = vadd.f32 %v1116_v12, %v800_v24  ;;  %v818_v18 = vadd.f32 %v3058_v22, %v3056_v19 }
 0x13b   :  { %v1120_v58 = vpop.f32.mrf.mxu1  ;;  %v1026_v61 = vadd.f32 %v951_v50, %v2897_v21 }
 0x13c   :  { %v1195_v63 = vadd.f32 %v1120_v58, %v804_v23  ;;  %v953_v47 = vpop.f32.mrf.mxu0 }
 0x13d   :  { %v1122_v25 = vpop.f32.mrf.mxu1  ;;  %v1217_v0 = vmax.f32 %v1024_v60, %v1026_v61  ;;  %v1027_v6 = vadd.f32 %v953_v47, %v2907_v26 }
 0x13e   :  { %v1229_v1 = vmax.f32 %v1193_v40, %v1195_v63  ;;  %v1196_v8 = vadd.f32 %v1122_v25, %v806_v39  ;;  %v957_v59 = vpop.f32.mrf.mxu0 }
 0x13f   :  { %v1126_v20 = vpop.f32.mrf.mxu1  ;;  %v1218_v11 = vmax.f32 %v1025_v4, %v1027_v6  ;;  %v1028_v25 = vadd.f32 %v957_v59, %v2917_v31 }
 0x140   :  { %v1241_v54 = vmax.f32 %v1217_v0, %v1229_v1  ;;  %v1230_v28 = vmax.f32 %v1194_v5, %v1196_v8  ;;  %v959_v21 = vpop.f32.mrf.mxu0  ;;  %v1197_v56 = vadd.f32 %v1126_v20, %v810_v16  ;;  %v828_v0 = vadd.f32 %v3068_v34, %v3066_v33 }
 0x141   :  { %v1128_v12 = vpop.f32.mrf.mxu1  ;;  %v1029_v60 = vadd.f32 %v959_v21, %v2927_v36  ;;  %v824_v21 = vadd.f32 %v3064_v30, %v3062_v29  ;;  %v830_v33 = vadd.f32 %v3072_v38, %v3070_v37 }
 0x142   :  { %v3130_v32 = vadd.f32 %v3120_v43, %v1241_v54  ;;  %v1242_v26 = vmax.f32 %v1218_v11, %v1230_v28  ;;  %v963_v23 = vpop.f32.mrf.mxu0  ;;  %v1198_v40 = vadd.f32 %v1128_v12, %v812_v15  ;;  %v840_v15 = vadd.f32 %v3082_v52, %v3080_v49  ;;  %v3904_v52 = vld [vmem:[#allocation12_spill] sm:$0xff] }
 0x143   :  { %v1132_v24 = vpop.f32.mrf.mxu1  ;;  %v1030_v9 = vadd.f32 %v963_v23, %v2937_v41  ;;  %v836_v49 = vadd.f32 %v3078_v48, %v3076_v45 }
 0x144   :  { %v1289_v3 = vmin.f32 %v3130_v32, 0.0  ;;  %v3135_v39 = vadd.f32 %v3123_v35, %v1242_v26  ;;  %v1199_v10 = vadd.f32 %v1132_v24, %v816_v55  ;;  %v965_v54 = vpop.f32.mrf.mxu0  ;;  %vm1277_vm2 = vcmp.gt.f32.partialorder %v3130_v32, 0.0 }
 0x145   :  { %v1134_v50 = vpop.f32.mrf.mxu1  ;;  %v1219_v58 = vmax.f32 %v1028_v25, %v1030_v9  ;;  %v1031_v61 = vadd.f32 %v965_v54, %v2947_v46 }
 0x146   :  { %v1301_v31 = vmul.f32 1.442695, %v1289_v3  ;;  %v1290_v59 = vmin.f32 %v3135_v39, 0.0  ;;  %v1231_v42 = vmax.f32 %v1197_v56, %v1199_v10  ;;  %v1200_v41 = vadd.f32 %v1134_v50, %v818_v18  ;;  %v969_v63 = vpop.f32.mrf.mxu0 }
 0x147   :  { %v1138_v4 = vpop.f32.mrf.mxu1  ;;  %v1220_v5 = vmax.f32 %v1029_v60, %v1031_v61  ;;  %v1032_v46 = vadd.f32 %v969_v63, %v2957_v51  ;;  %v842_v61 = vadd.f32 %v3904_v52, %v3084_v53  ;;  %vm1278_vm3 = vcmp.gt.f32.partialorder %v3135_v39, 0.0 }
 0x148   :  { %2278 = vpow2.f32 %v1301_v31  ;;  %v1303_v13 = vmul.f32 1.442695, %v1290_v59  ;;  %v1243_v14 = vmax.f32 %v1219_v58, %v1231_v42  ;;  %v1232_v19 = vmax.f32 %v1198_v40, %v1200_v41  ;;  %v971_v22 = vpop.f32.mrf.mxu0 }
 0x149   :  { %v1140_v47 = vpop.f32.mrf.mxu1  ;;  %v1201_v11 = vadd.f32 %v1138_v4, %v3060_v27  ;;  %v1033_v51 = vadd.f32 %v971_v22, %v2971_v57 }
 0x14a   :  { %v3148_v1 = vadd.f32 %v3120_v43, %v1243_v14  ;;  %2280 = vpow2.f32 %v1303_v13  ;;  %v1244_v36 = vmax.f32 %v1220_v5, %v1232_v19  ;;  %v975_v6 = vpop.f32.mrf.mxu0  ;;  %v1202_v23 = vadd.f32 %v1140_v47, %v824_v21  ;;  %v3906_v19 = vld [vmem:[#allocation3_spill] sm:$0xff] }
 0x14b   :  { %v1144_v8 = vpop.f32.mrf.mxu1  ;;  %v1034_v28 = vadd.f32 %v975_v6, %v2981_v62 }
 0x14c   :  { %v1291_v20 = vmin.f32 %v3148_v1, 0.0  ;;  %v1203_v16 = vadd.f32 %v1144_v8, %v828_v0  ;;  %v3159_v34 = vadd.f32 %v3123_v35, %v1244_v36  ;;  %v977_v12 = vpop.f32.mrf.mxu0  ;;  %vm1279_vm5 = vcmp.gt.f32.partialorder %v3148_v1, 0.0 }
 0x14d   :  { %v1146_v55 = vpop.f32.mrf.mxu1  ;;  %v1221_v25 = vmax.f32 %v1032_v46, %v1034_v28  ;;  %v1035_v27 = vadd.f32 %v977_v12, %v2988_v2 }
 0x14e   :  { %v1305_v26 = vmul.f32 1.442695, %v1291_v20  ;;  %v1233_v56 = vmax.f32 %v1201_v11, %v1203_v16  ;;  %v1292_v62 = vmin.f32 %v3159_v34, 0.0  ;;  %v1204_v24 = vadd.f32 %v1146_v55, %v830_v33  ;;  %v981_v29 = vpop.f32.mrf.mxu0  ;;  %v3907_v33 = vld [vmem:[#allocation4_spill] sm:$0xff]  ;;  %v3908_v55 = vld [vmem:[#allocation13_spill] sm:$0xff] }
 0x14f   :  { %v1150_v30 = vpop.f32.mrf.mxu1  ;;  %v1222_v38 = vmax.f32 %v1033_v51, %v1035_v27  ;;  %v1036_v54 = vadd.f32 %v981_v29, %v2995_v7  ;;  %v3905_v7 = vld [vmem:[#allocation2_spill] sm:$0xff]  ;;  %vm1280_vm4 = vcmp.gt.f32.partialorder %v3159_v34, 0.0 }
 0x150   :  { %2282 = vpow2.f32 %v1305_v26  ;;  %v1245_v37 = vmax.f32 %v1221_v25, %v1233_v56  ;;  %v1307_v3 = vmul.f32 1.442695, %v1292_v62  ;;  %v1234_v9 = vmax.f32 %v1202_v23, %v1204_v24  ;;  %v983_v10 = vpop.f32.mrf.mxu0  ;;  %v165_v62 = vld [vmem:[%s3876_s3 + $0x318] sm:$0xff]  ;;  %v3909_v24 = vld [vmem:[#allocation6_spill] sm:$0xff] }
 0x151   :  { %v1152_v57 = vpop.f32.mrf.mxu1  ;;  %v1205_v58 = vadd.f32 %v1150_v30, %v3074_v44  ;;  %v1037_v63 = vadd.f32 %v983_v10, %v3905_v7  ;;  %v3910_v30 = vld [vmem:[#allocation15_spill] sm:$0xff]  ;;  %v3916_v7 = vmov 0.0  }
 0x152   :  { %v3167_v18 = vadd.f32 %v3120_v43, %v1245_v37  ;;  %v1246_v2 = vmax.f32 %v1222_v38, %v1234_v9  ;;  %v987_v50 = vpop.f32.mrf.mxu0  ;;  %2284 = vpow2.f32 %v1307_v3  ;;  %v1206_v0 = vadd.f32 %v1152_v57, %v836_v49  ;;  %v3911_v3 = vld [vmem:[#allocation16_spill] sm:$0xff]  ;;  %v3912_v9 = vld [vmem:[#allocation17_spill] sm:$0xff]  ;;  %v3915_v49 = vld [vmem:[#allocation14_spill] sm:$0xff] }
 0x153   :  { %v1156_v31 = vpop.f32.mrf.mxu1  ;;  %v1038_v42 = vadd.f32 %v987_v50, %v3007_v17  ;;  %v854_v10 = vadd.f32 %v3912_v9, %v3911_v3  ;;  %v3913_v50 = vld [vmem:[#allocation5_spill] sm:$0xff] }
 0x154   :  { %v1293_v59 = vmin.f32 %v3167_v18, 0.0  ;;  %v1207_v60 = vadd.f32 %v1156_v31, %v840_v15  ;;  %v3178_v41 = vadd.f32 %v3123_v35, %v1246_v2  ;;  %v989_v4 = vpop.f32.mrf.mxu0  ;;  %vm1281_vm7 = vcmp.gt.f32.partialorder %v3167_v18, 0.0 }
 0x155   :  { %v2279_v40 = vpop.eup %2278  ;;  %v1158_v13 = vpop.f32.mrf.mxu1  ;;  %v1223_v5 = vmax.f32 %v1036_v54, %v1038_v42  ;;  %v1039_v17 = vadd.f32 %v989_v4, %v3906_v19  ;;  %v164_v54 = vld [vmem:[%s3876_s3 + $0x310] sm:$0xff] }
 0x156   :  { %v1309_v14 = vmul.f32 1.442695, %v1293_v59  ;;  %v1235_v44 = vmax.f32 %v1205_v58, %v1207_v60  ;;  %v1294_v47 = vmin.f32 %v3178_v41, 0.0  ;;  %v1208_v45 = vadd.f32 %v1158_v13, %v842_v61  ;;  %v993_v48 = vpop.f32.mrf.mxu0  ;;  %v3914_v58 = vld [vmem:[#allocation7_spill] sm:$0xff]  ;;  %v3917_v19 = vld [vmem:[#allocation8_spill] sm:$0xff] }
 0x157   :  { %v2281_v22 = vpop.eup %2280  ;;  %v1162_v36 = vpop.f32.mrf.mxu1  ;;  %v1224_v46 = vmax.f32 %v1037_v63, %v1039_v17  ;;  %v2177_v6 = vadd.f32 -1.0, %v2279_v40  ;;  %v1040_v51 = vadd.f32 %v993_v48, %v3907_v33  ;;  %v163_v13 = vld [vmem:[%s3876_s3 + $0x308] sm:$0xff]  ;;  %vm1282_vm6 = vcmp.gt.f32.partialorder %v3178_v41, 0.0 }
 0x158   :  { %v1247_v53 = vmax.f32 %v1223_v5, %v1235_v44  ;;  %v1311_v8 = vmul.f32 1.442695, %v1294_v47  ;;  %v1236_v20 = vmax.f32 %v1206_v0, %v1208_v45  ;;  %v995_v11 = vpop.f32.mrf.mxu0  ;;  %v2178_v16 = vadd.f32 -1.0, %v2281_v22  ;;  %v3918_v45 = vld [vmem:[#allocation18_spill] sm:$0xff] }
 0x159   :  { %v1164_v28 = vpop.f32.mrf.mxu1  ;;  %2286 = vpow2.f32 %v1309_v14  ;;  %v1209_v26 = vadd.f32 %v1162_v36, %v3908_v55  ;;  %v3204_v38 = vsel %vm1277_vm2, %v3130_v32, %v2177_v6  ;;  %v1041_v31 = vadd.f32 %v995_v11, %v3913_v50 }
 0x15a   :  { %v3185_v21 = vadd.f32 %v3120_v43, %v1247_v53  ;;  %2288 = vpow2.f32 %v1311_v8  ;;  %v1248_v12 = vmax.f32 %v1224_v46, %v1236_v20  ;;  %v999_v25 = vpop.f32.mrf.mxu0  ;;  %v3191_v27 = vsel %vm1278_vm3, %v3135_v39, %v2178_v16  ;;  %v162_v46 = vld [vmem:[%s3876_s3 + $0x300] sm:$0xff]  ;;  %v3919_v20 = vld [vmem:[#allocation9_spill] sm:$0xff] }
 0x15b   :  { %v1168_v56 = vpop.f32.mrf.mxu1  ;;  %v1042_v29 = vadd.f32 %v999_v25, %v3909_v24  ;;  %2193 = vmatprep.mubr.msk.f32.mxu1 %vm1349_vm1, %v3191_v27  ;;  %v1210_v52 = vadd.f32 %v1164_v28, %v3915_v49  ;;  %v3920_v28 = vld [vmem:[#allocation19_spill] sm:$0xff]  ;;  %v161_v24 = vld [vmem:[%s3876_s3 + $0x2f8] sm:$0xff]  ;;  %vm2074_vm2 = vcmask 31744  }
 0x15c   :  { %v1295_v23 = vmin.f32 %v3185_v21, 0.0  ;;  %v1211_v37 = vadd.f32 %v1168_v56, %v3910_v30  ;;  %v3209_v57 = vadd.f32 %v3123_v35, %v1248_v12  ;;  %1515 = vmatmul.mubr.f32.vlgmr.msra.gmra.mxu1 %v3204_v38  ;;  %v1001_v15 = vpop.f32.mrf.mxu0  ;;  %v3922_v56 = vld [vmem:[#allocation20_spill] sm:$0xff]  ;;  %v159_v49 = vld [vmem:[%s3876_s3 + $0x2e8] sm:$0xff]  ;;  %vm1283_vm9 = vcmp.gt.f32.partialorder %v3185_v21, 0.0 }
 0x15d   :  { %v2283_v39 = vpop.eup %2282  ;;  %v1170_v2 = vpop.f32.mrf.mxu1  ;;  %v1225_v59 = vmax.f32 %v1040_v51, %v1042_v29  ;;  %1621 = vmatpush1.msra.mxu1 %v165_v62  ;;  %v1043_v42 = vadd.f32 %v1001_v15, %v3914_v58 }
 0x15e   :  { %v1237_v32 = vmax.f32 %v1209_v26, %v1211_v37  ;;  %v1313_v60 = vmul.f32 1.442695, %v1295_v23  ;;  %v1296_v40 = vmin.f32 %v3209_v57, 0.0  ;;  %v1212_v61 = vadd.f32 %v1170_v2, %v854_v10  ;;  %1622 = vmatprep.subr.mxu1 %v3916_v7  ;;  %v1005_v63 = vpop.f32.mrf.mxu0  ;;  %v3921_v26 = vld [vmem:[#allocation10_spill] sm:$0xff]  ;;  %v193_v23 = vld [vmem:[%s3876_s3 + $0x3f8] sm:$0xff]  ;;  %v3923_v10 = vld [vmem:[#allocation11_spill] sm:$0xff] }
 0x15f   :  { %v1174_v4 = vpop.f32.mrf.mxu1  ;;  %v2285_v14 = vpop.eup %2284  ;;  %v1226_v44 = vmax.f32 %v1041_v31, %v1043_v42  ;;  %1623 = vmatpush1.msra.mxu1 %v164_v54  ;;  %v1044_v17 = vadd.f32 %v1005_v63, %v3917_v19  ;;  %v2179_v22 = vadd.f32 -1.0, %v2283_v39  ;;  %v192_v2 = vld [vmem:[%s3876_s3 + $0x3f0] sm:$0xff]  ;;  %v3924_v31 = vld [vmem:[#allocation21_spill] sm:$0xff]  ;;  %vm1284_vm8 = vcmp.gt.f32.partialorder %v3209_v57, 0.0 }
 0x160   :  { %v1249_v5 = vmax.f32 %v1225_v59, %v1237_v32  ;;  %v1315_v47 = vmul.f32 1.442695, %v1296_v40  ;;  %v1238_v0 = vmax.f32 %v1210_v52, %v1212_v61  ;;  %v1213_v48 = vadd.f32 %v1174_v4, %v3918_v45  ;;  %1624 = vmatprep.subr.mxu1 %v3916_v7  ;;  %v1007_v36 = vpop.f32.mrf.mxu0  ;;  %v191_v40 = vld [vmem:[%s3876_s3 + $0x3e8] sm:$0xff] }
 0x161   :  { %v1176_v53 = vpop.f32.mrf.mxu1  ;;  %v2180_v6 = vadd.f32 -1.0, %v2285_v14  ;;  %1625 = vmatpush1.msra.mxu1 %v163_v13  ;;  %v1045_v11 = vadd.f32 %v1007_v36, %v3919_v20  ;;  %v3257_v29 = vsel %vm1279_vm5, %v3148_v1, %v2179_v22  ;;  %v160_v1 = vld [vmem:[%s3876_s3 + $0x2f0] sm:$0xff]  ;;  %v155_v20 = vld [vmem:[%s3876_s3 + $0x2c8] sm:$0xff] }
 0x162   :  { %v3230_v8 = vadd.f32 %v3120_v43, %v1249_v5  ;;  %v1214_v16 = vadd.f32 %v1176_v53, %v3920_v28  ;;  %2290 = vpow2.f32 %v1315_v47  ;;  %v1250_v33 = vmax.f32 %v1226_v44, %v1238_v0  ;;  %1626 = vmatprep.subr.mxu1 %v3916_v7  ;;  %v1011_v51 = vpop.f32.mrf.mxu0  ;;  %v190_v5 = vld [vmem:[%s3876_s3 + $0x3e0] sm:$0xff]  ;;  %v188_v36 = vld [vmem:[%s3876_s3 + $0x3d0] sm:$0xff] }
 0x163   :  { %v1180_v12 = vpop.f32.mrf.mxu1  ;;  %v3237_v55 = vsel %vm1280_vm4, %v3159_v34, %v2180_v6  ;;  %1627 = vmatpush1.msra.mxu1 %v162_v46  ;;  %v1046_v25 = vadd.f32 %v1011_v51, %v3921_v26  ;;  %2292 = vpow2.f32 %v1313_v60  ;;  %v158_v44 = vld [vmem:[%s3876_s3 + $0x2e0] sm:$0xff]  ;;  %v156_v53 = vld [vmem:[%s3876_s3 + $0x2d0] sm:$0xff] }
 0x164   :  { %v1215_v62 = vadd.f32 %v1180_v12, %v3922_v56  ;;  %2189 = vmatprep.mubr.msk.f32.mxu0 %vm1349_vm1, %v3237_v55  ;;  %v3251_v34 = vadd.f32 %v3123_v35, %v1250_v33  ;;  %2194 = vmatprep.mubr.msk.f32.mxu1 %vm1349_vm1, %v3237_v55  ;;  %v1013_v30 = vpop.f32.mrf.mxu0  ;;  %v1297_v39 = vmin.f32 %v3230_v8, 0.0  ;;  %v154_v28 = vld [vmem:[%s3876_s3 + $0x2c0] sm:$0xff]  ;;  %v153_v12 = vld [vmem:[%s3876_s3 + $0x2b8] sm:$0xff]  ;;  %v152_v56 = vld [vmem:[%s3876_s3 + $0x2b0] sm:$0xff]  ;;  %vm1285_vm11 = vcmp.gt.f32.partialorder %v3230_v8, 0.0 }
 0x165   :  { %1628 = vmatprep.subr.mxu1 %v3916_v7  ;;  %v1182_v37 = vpop.f32.mrf.mxu1  ;;  %v1227_v3 = vmax.f32 %v1044_v17, %v1046_v25  ;;  %1427 = vmatmul.mubr.f32.vlgmr.msra.gmra.mxu0 %v3257_v29  ;;  %v1047_v15 = vadd.f32 %v1013_v30, %v3923_v10  ;;  %v184_v25 = vld [vmem:[%s3876_s3 + $0x3b0] sm:$0xff]  ;;  %v182_v30 = vld [vmem:[%s3876_s3 + $0x3a0] sm:$0xff] }
 0x166   :  { %v1239_v9 = vmax.f32 %v1213_v48, %v1215_v62  ;;  %1520 = vmatmul.mubr.f32.gmra.mxu1 %v3257_v29  ;;  %v2287_v54 = vpop.eup %2286  ;;  %v1298_v50 = vmin.f32 %v3251_v34, 0.0  ;;  %1536 = vmatpush1.msra.mxu0 %v193_v23  ;;  %v1216_v59 = vadd.f32 %v1182_v37, %v3924_v31  ;;  %v1017_v13 = vpop.f32.mrf.mxu0  ;;  %v1317_v14 = vmul.f32 1.442695, %v1297_v39  ;;  %v180_v10 = vld [vmem:[%s3876_s3 + $0x390] sm:$0xff]  ;;  %v173_v31 = vld [vmem:[%s3876_s3 + $0x358] sm:$0xff] }
 0x167   :  { %1629 = vmatpush1.msra.mxu1 %v161_v24  ;;  %v1186_v32 = vpop.f32.mrf.mxu1  ;;  %v2289_v58 = vpop.eup %2288  ;;  %v1228_v60 = vmax.f32 %v1045_v11, %v1047_v15  ;;  %1537 = vmatprep.subr.mxu0 %v3916_v7  ;;  %v2181_v47 = vadd.f32 -1.0, %v2287_v54  ;;  %v186_v11 = vld [vmem:[%s3876_s3 + $0x3c0] sm:$0xff]  ;;  %v151_v24 = vld [vmem:[%s3876_s3 + $0x2a8] sm:$0xff]  ;;  %vm1286_vm10 = vcmp.gt.f32.partialorder %v3251_v34, 0.0  ;;  %v176_v15 = vld [vmem:[%s3876_s3 + $0x370] sm:$0xff] }
 0x168   :  { %v1251_v42 = vmax.f32 %v1227_v3, %v1239_v9  ;;  %1630 = vmatprep.subr.mxu1 %v3916_v7  ;;  %v1319_v52 = vmul.f32 1.442695, %v1298_v50  ;;  %v1240_v61 = vmax.f32 %v1214_v16, %v1216_v59  ;;  %1538 = vmatpush1.msra.mxu0 %v192_v2  ;;  %v2182_v63 = vadd.f32 -1.0, %v2289_v58  ;;  %v1018_v0 = vpop.f32.mrf.mxu0  ;;  %v177_v3 = vld [vmem:[%s3876_s3 + $0x378] sm:$0xff]  ;;  %v175_v2 = vld [vmem:[%s3876_s3 + $0x368] sm:$0xff]  ;;  %v174_v54 = vld [vmem:[%s3876_s3 + $0x360] sm:$0xff] }
 0x169   :  { %1631 = vmatpush1.msra.mxu1 %v160_v1  ;;  %v1187_v4 = vpop.f32.mrf.mxu1  ;;  %1539 = vmatprep.subr.mxu0 %v3916_v7  ;;  %v178_v1 = vld [vmem:[%s3876_s3 + $0x380] sm:$0xff]  ;;  %v205_v50 = vld [vmem:[%s3876_s3 + $0x458] sm:$0xff]  ;;  %v204_v59 = vld [vmem:[%s3876_s3 + $0x450] sm:$0xff] }
 0x16a   :  { %1632 = vmatprep.subr.mxu1 %v3916_v7  ;;  %v3289_v19 = vadd.f32 %v3120_v43, %v1251_v42  ;;  %v1252_v17 = vmax.f32 %v1228_v60, %v1240_v61  ;;  %1540 = vmatpush1.msra.mxu0 %v191_v40  ;;  %v3292_v22 = vsel %vm1282_vm6, %v3178_v41, %v2182_v63  ;;  %2294 = vpow2.f32 %v1319_v52  ;;  %v189_v43 = vld [vmem:[%s3876_s3 + $0x3d8] sm:$0xff]  ;;  %v172_v32 = vld [vmem:[%s3876_s3 + $0x350] sm:$0xff]  ;;  %v203_v58 = vld [vmem:[%s3876_s3 + $0x448] sm:$0xff] }
 0x16b   :  { %1633 = vmatpush1.msra.mxu1 %v159_v49  ;;  %1541 = vmatprep.subr.mxu0 %v3916_v7  ;;  %v157_v41 = vld [vmem:[%s3876_s3 + $0x2d8] sm:$0xff]  ;;  %2296 = vpow2.f32 %v1317_v14  ;;  %v171_v42 = vld [vmem:[%s3876_s3 + $0x348] sm:$0xff]  ;;  %v202_v60 = vld [vmem:[%s3876_s3 + $0x440] sm:$0xff] }
 0x16c   :  { %1634 = vmatprep.subr.mxu1 %v3916_v7  ;;  %v3297_v45 = vadd.f32 %v3123_v35, %v1252_v17  ;;  %1542 = vmatpush1.msra.mxu0 %v190_v5  ;;  %v3313_v35 = vsel %vm1281_vm7, %v3167_v18, %v2181_v47  ;;  %v187_v18 = vld [vmem:[%s3876_s3 + $0x3c8] sm:$0xff]  ;;  %v170_v40 = vld [vmem:[%s3876_s3 + $0x340] sm:$0xff]  ;;  %v201_v49 = vld [vmem:[%s3876_s3 + $0x438] sm:$0xff]  ;;  %vm1287_vm13 = vcmp.gt.f32.partialorder %v3289_v19, 0.0 }
 0x16d   :  { %1635 = vmatpush1.msra.mxu1 %v158_v44  ;;  %2190 = vmatprep.mubr.msk.f32.mxu0 %vm1349_vm1, %v3292_v22  ;;  %v169_v52 = vld [vmem:[%s3876_s3 + $0x338] sm:$0xff]  ;;  %v200_v61 = vld [vmem:[%s3876_s3 + $0x430] sm:$0xff]  ;;  %v199_v4 = vld [vmem:[%s3876_s3 + $0x428] sm:$0xff] }
 0x16e   :  { %2195 = vmatprep.mubr.msk.f32.mxu1 %vm1349_vm1, %v3292_v22  ;;  %1543 = vmatprep.subr.mxu0 %v3916_v7  ;;  %v168_v63 = vld [vmem:[%s3876_s3 + $0x330] sm:$0xff]  ;;  %v167_v13 = vld [vmem:[%s3876_s3 + $0x328] sm:$0xff]  ;;  %v198_v14 = vld [vmem:[%s3876_s3 + $0x420] sm:$0xff]  ;;  %vm1288_vm12 = vcmp.gt.f32.partialorder %v3297_v45, 0.0 }
 0x16f   :  { %1636 = vmatprep.subr.mxu1 %v3916_v7  ;;  %v2291_v48 = vpop.eup %2290  ;;  %1432 = vmatmul.mubr.f32.gmra.mxu0 %v3313_v35  ;;  %v166_v5 = vld [vmem:[%s3876_s3 + $0x320] sm:$0xff]  ;;  %v197_v17 = vld [vmem:[%s3876_s3 + $0x418] sm:$0xff] }
 0x170   :  { %1525 = vmatmul.mubr.f32.gmra.mxu1 %v3313_v35  ;;  %1544 = vmatpush1.msra.mxu0 %v189_v43  ;;  %v2184_v46 = vadd.f32 -1.0, %v2291_v48  ;;  %v2293_v6 = vpop.eup %2292  ;;  %v221_v47 = vld [vmem:[%s3876_s3 + $0x4d8] sm:$0xff]  ;;  %v196_v43 = vld [vmem:[%s3876_s3 + $0x410] sm:$0xff] }
 0x171   :  { %1637 = vmatpush1.msra.mxu1 %v157_v41  ;;  %1545 = vmatprep.subr.mxu0 %v3916_v7  ;;  %v2183_v33 = vadd.f32 -1.0, %v2293_v6  ;;  %v220_v41 = vld [vmem:[%s3876_s3 + $0x4d0] sm:$0xff]  ;;  %v137_v6 = vld [vmem:[%s3876_s3 + $0x238] sm:$0xff] }
 0x172   :  { %1638 = vmatprep.subr.mxu1 %v3916_v7  ;;  %1546 = vmatpush1.msra.mxu0 %v188_v36  ;;  %v3341_v16 = vsel %vm1284_vm8, %v3209_v57, %v2184_v46  ;;  %v185_v57 = vld [vmem:[%s3876_s3 + $0x3b8] sm:$0xff]  ;;  %v219_v36 = vld [vmem:[%s3876_s3 + $0x4c8] sm:$0xff]  ;;  %v218_v46 = vld [vmem:[%s3876_s3 + $0x4c0] sm:$0xff] }
 0x173   :  { %1639 = vmatpush1.msra.mxu1 %v156_v53  ;;  %1547 = vmatprep.subr.mxu0 %v3916_v7  ;;  %v3359_v26 = vsel %vm1283_vm9, %v3185_v21, %v2183_v33  ;;  %v183_v21 = vld [vmem:[%s3876_s3 + $0x3a8] sm:$0xff]  ;;  %v134_v33 = vld [vmem:[%s3876_s3 + $0x220] sm:$0xff] }
 0x174   :  { %1640 = vmatprep.subr.mxu1 %v3916_v7  ;;  %1548 = vmatpush1.msra.mxu0 %v187_v18  ;;  %v217_v18 = vld [vmem:[%s3876_s3 + $0x4b8] sm:$0xff] }
 0x175   :  { %1641 = vmatpush1.msra.mxu1 %v155_v20  ;;  %1549 = vmatprep.subr.mxu0 %v3916_v7  ;;  %v216_v20 = vld [vmem:[%s3876_s3 + $0x4b0] sm:$0xff] }
 0x176   :  { %1642 = vmatprep.subr.mxu1 %v3916_v7  ;;  %1550 = vmatpush1.msra.mxu0 %v186_v11  ;;  %v135_v11 = vld [vmem:[%s3876_s3 + $0x228] sm:$0xff] }
 0x177   :  { %1643 = vmatpush1.msra.mxu1 %v154_v28  ;;  %v2295_v51 = vpop.eup %2294  ;;  %2191 = vmatprep.mubr.msk.f32.mxu0 %vm1349_vm1, %v3341_v16  ;;  %v215_v28 = vld [vmem:[%s3876_s3 + $0x4a8] sm:$0xff] }
 0x178   :  { %2196 = vmatprep.mubr.msk.f32.mxu1 %vm1349_vm1, %v3341_v16  ;;  %1551 = vmatprep.subr.mxu0 %v3916_v7  ;;  %v2186_v62 = vadd.f32 -1.0, %v2295_v51  ;;  %v2297_v23 = vpop.eup %2296  ;;  %v214_v51 = vld [vmem:[%s3876_s3 + $0x4a0] sm:$0xff] }
 0x179   :  { %1644 = vmatprep.subr.mxu1 %v3916_v7  ;;  %1437 = vmatmul.mubr.f32.gmra.mxu0 %v3359_v26  ;;  %v2185_v39 = vadd.f32 -1.0, %v2297_v23  ;;  %v211_v23 = vld [vmem:[%s3876_s3 + $0x488] sm:$0xff] }
 0x17a   :  { %1530 = vmatmul.mubr.f32.gmra.mxu1 %v3359_v26  ;;  %1552 = vmatpush1.msra.mxu0 %v185_v57  ;;  %v3389_v37 = vsel %vm1286_vm10, %v3251_v34, %v2186_v62  ;;  %v181_v34 = vld [vmem:[%s3876_s3 + $0x398] sm:$0xff]  ;;  %v131_v62 = vld [vmem:[%s3876_s3 + $0x208] sm:$0xff] }
 0x17b   :  { %1645 = vmatpush1.msra.mxu1 %v153_v12  ;;  %1553 = vmatprep.subr.mxu0 %v3916_v7  ;;  %v3405_v9 = vsel %vm1285_vm11, %v3230_v8, %v2185_v39  ;;  %v179_v8 = vld [vmem:[%s3876_s3 + $0x388] sm:$0xff]  ;;  %v133_v57 = vld [vmem:[%s3876_s3 + $0x218] sm:$0xff]  ;;  %v208_v39 = vld [vmem:[%s3876_s3 + $0x470] sm:$0xff] }
 0x17c   :  { %1646 = vmatprep.subr.mxu1 %v3916_v7  ;;  %2201 = vmatprep.mubr.msk.f32.mxu1 %vm1349_vm1, %v3191_v27  ;;  %v150_v27 = vld [vmem:[%s3876_s3 + $0x2a0] sm:$0xff]  ;;  %v213_v12 = vld [vmem:[%s3876_s3 + $0x498] sm:$0xff] }
 0x17d   :  { %1554 = vmatpush1.msra.mxu0 %v184_v25  ;;  %1647 = vmatpush1.msra.mxu1 %v152_v56  ;;  %v132_v25 = vld [vmem:[%s3876_s3 + $0x210] sm:$0xff] }
 0x17e   :  { %1555 = vmatprep.subr.mxu0 %v3916_v7  ;;  %1648 = vmatprep.subr.mxu1 %v3916_v7  ;;  %v212_v56 = vld [vmem:[%s3876_s3 + $0x490] sm:$0xff] }
 0x17f   :  { %1556 = vmatpush1.msra.mxu0 %v183_v21  ;;  %1649 = vmatpush1.msra.mxu1 %v151_v24  ;;  %v130_v21 = vld [vmem:[%s3876_s3 + $0x200] sm:$0xff] }
 0x180   :  { %1557 = vmatprep.subr.mxu0 %v3916_v7  ;;  %1650 = vmatprep.subr.mxu1 %v3916_v7  ;;  %v1190_v44 = vpop.f32.mrf.mxu1  ;;  %v210_v24 = vld [vmem:[%s3876_s3 + $0x480] sm:$0xff] }
 0x181   :  { %1558 = vmatpush1.msra.mxu0 %v182_v30  ;;  %1651 = vmatpush1.msra.mxu1 %v150_v27  ;;  %v129_v30 = vld [vmem:[%s3876_s3 + $0x1f8] sm:$0xff] }
 0x182   :  { %2192 = vmatprep.mubr.msk.f32.mxu0 %vm1349_vm1, %v3389_v37  ;;  %1559 = vmatprep.subr.mxu0 %v3916_v7  ;;  %v1191_v0 = vpop.f32.mrf.mxu1  ;;  %v209_v27 = vld [vmem:[%s3876_s3 + $0x478] sm:$0xff] }
 0x183   :  { %1660 = vmatprep.subr.mxu1 %v3916_v7  ;;  %1442 = vmatmul.mubr.f32.gmra.mxu0 %v3405_v9  ;;  %v145_v44 = vld [vmem:[%s3876_s3 + $0x278] sm:$0xff]  ;;  %v224_v0 = vld [vmem:[%s3876_s3 + $0x4f0] sm:$0xff] }
 0x184   :  { %1661 = vmatpush2.msra.mxu1 %v177_v3  ;;  %1560 = vmatpush1.msra.mxu0 %v181_v34  ;;  %v127_v3 = vld [vmem:[%s3876_s3 + $0x1e8] sm:$0xff] }
 0x185   :  { %2197 = vmatprep.mubr.msk.f32.mxu0 %vm1349_vm1, %v3237_v55  ;;  %1561 = vmatprep.subr.mxu0 %v3916_v7  ;;  %v207_v34 = vld [vmem:[%s3876_s3 + $0x468] sm:$0xff] }
 0x186   :  { %1662 = vmatprep.subr.mxu1 %v3916_v7  ;;  %1562 = vmatpush1.msra.mxu0 %v180_v10  ;;  %v1021_v48 = vpop.f32.mrf.mxu0  ;;  %v126_v10 = vld [vmem:[%s3876_s3 + $0x1e0] sm:$0xff] }
 0x187   :  { %1663 = vmatpush2.msra.mxu1 %v176_v15  ;;  %1563 = vmatprep.subr.mxu0 %v3916_v7  ;;  %v206_v15 = vld [vmem:[%s3876_s3 + $0x460] sm:$0xff] }
 0x188   :  { %1664 = vmatprep.subr.mxu1 %v3916_v7  ;;  %1564 = vmatpush1.msra.mxu0 %v179_v8  ;;  %v1022_v53 = vpop.f32.mrf.mxu0  ;;  %v125_v8 = vld [vmem:[%s3876_s3 + $0x1d8] sm:$0xff]  ;;  %v142_v48 = vld [vmem:[%s3876_s3 + $0x260] sm:$0xff] }
 0x189   :  { %1665 = vmatpush2.msra.mxu1 %v175_v2  ;;  %1565 = vmatprep.subr.mxu0 %v3916_v7  ;;  %v233_v2 = vld [vmem:[%s3876_s3 + $0x538] sm:$0xff]  ;;  %v140_v53 = vld [vmem:[%s3876_s3 + $0x250] sm:$0xff] }
 0x18a   :  { %1666 = vmatprep.subr.mxu1 %v3916_v7  ;;  %1566 = vmatpush1.msra.mxu0 %v178_v1  ;;  %v124_v1 = vld [vmem:[%s3876_s3 + $0x1d0] sm:$0xff] }
 0x18b   :  { %1667 = vmatpush2.msra.mxu1 %v174_v54  ;;  %1575 = vmatprep.subr.mxu0 %v3916_v7  ;;  %v232_v54 = vld [vmem:[%s3876_s3 + $0x530] sm:$0xff] }
 0x18c   :  { %1668 = vmatprep.subr.mxu1 %v3916_v7  ;;  %1576 = vmatpush2.msra.mxu0 %v205_v50  ;;  %v123_v50 = vld [vmem:[%s3876_s3 + $0x1c8] sm:$0xff] }
 0x18d   :  { %1669 = vmatpush2.msra.mxu1 %v173_v31  ;;  %1577 = vmatprep.subr.mxu0 %v3916_v7  ;;  %v231_v31 = vld [vmem:[%s3876_s3 + $0x528] sm:$0xff] }
 0x18e   :  { %1670 = vmatprep.subr.mxu1 %v3916_v7  ;;  %1578 = vmatpush2.msra.mxu0 %v204_v59  ;;  %v1300_v59 = vmin.f32 %v3297_v45, 0.0 }
 0x18f   :  { %1671 = vmatpush2.msra.mxu1 %v172_v32  ;;  %1579 = vmatprep.subr.mxu0 %v3916_v7  ;;  %v122_v32 = vld [vmem:[%s3876_s3 + $0x1c0] sm:$0xff] }
 0x190   :  { %1672 = vmatprep.subr.mxu1 %v3916_v7  ;;  %1580 = vmatpush2.msra.mxu0 %v203_v58  ;;  %v230_v58 = vld [vmem:[%s3876_s3 + $0x520] sm:$0xff] }
 0x191   :  { %1673 = vmatpush2.msra.mxu1 %v171_v42  ;;  %1581 = vmatprep.subr.mxu0 %v3916_v7  ;;  %v149_v42 = vld [vmem:[%s3876_s3 + $0x298] sm:$0xff] }
 0x192   :  { %1674 = vmatprep.subr.mxu1 %v3916_v7  ;;  %1582 = vmatpush2.msra.mxu0 %v202_v60  ;;  %v229_v60 = vld [vmem:[%s3876_s3 + $0x518] sm:$0xff] }
 0x193   :  { %1675 = vmatpush2.msra.mxu1 %v170_v40  ;;  %1583 = vmatprep.subr.mxu0 %v3916_v7  ;;  %v1299_v40 = vmin.f32 %v3289_v19, 0.0 }
 0x194   :  { %1676 = vmatprep.subr.mxu1 %v3916_v7  ;;  %1584 = vmatpush2.msra.mxu0 %v201_v49  ;;  %v1323_v49 = vmul.f32 1.442695, %v1300_v59 }
 0x195   :  { %1677 = vmatpush2.msra.mxu1 %v169_v52  ;;  %1585 = vmatprep.subr.mxu0 %v3916_v7  ;;  %v148_v52 = vld [vmem:[%s3876_s3 + $0x290] sm:$0xff] }
 0x196   :  { %1678 = vmatprep.subr.mxu1 %v3916_v7  ;;  %1586 = vmatpush2.msra.mxu0 %v200_v61  ;;  %v228_v61 = vld [vmem:[%s3876_s3 + $0x510] sm:$0xff]  ;;  %2298 = vpow2.f32 %v1323_v49 }
 0x197   :  { %1679 = vmatpush2.msra.mxu1 %v168_v63  ;;  %1587 = vmatprep.subr.mxu0 %v3916_v7  ;;  %v147_v63 = vld [vmem:[%s3876_s3 + $0x288] sm:$0xff] }
 0x198   :  { %1680 = vmatprep.subr.mxu1 %v3916_v7  ;;  %1588 = vmatpush2.msra.mxu0 %v199_v4  ;;  %v227_v4 = vld [vmem:[%s3876_s3 + $0x508] sm:$0xff] }
 0x199   :  { %1681 = vmatpush2.msra.mxu1 %v167_v13  ;;  %1589 = vmatprep.subr.mxu0 %v3916_v7  ;;  %v1321_v13 = vmul.f32 1.442695, %v1299_v40 }
 0x19a   :  { %1682 = vmatprep.subr.mxu1 %v3916_v7  ;;  %1590 = vmatpush2.msra.mxu0 %v198_v14  ;;  %v146_v14 = vld [vmem:[%s3876_s3 + $0x280] sm:$0xff] }
 0x19b   :  { %1683 = vmatpush2.msra.mxu1 %v166_v5  ;;  %1591 = vmatprep.subr.mxu0 %v3916_v7  ;;  %v226_v5 = vld [vmem:[%s3876_s3 + $0x500] sm:$0xff]  ;;  %2300 = vpow2.f32 %v1321_v13 }
 0x19c   :  { %1685 = vmatmul.mubr.f32.vlgmr.msra.gmra.mxu1 %v3204_v38  ;;  %1797 = vmatprep.subr.mxu1 %v3916_v7  ;;  %v195_v38 = vld [vmem:[%s3876_s3 + $0x408] sm:$0xff] }
 0x19d   :  { %1592 = vmatpush2.msra.mxu0 %v197_v17  ;;  %2202 = vmatprep.mubr.msk.f32.mxu1 %vm1349_vm1, %v3237_v55  ;;  %v194_v55 = vld [vmem:[%s3876_s3 + $0x400] sm:$0xff]  ;;  %v225_v17 = vld [vmem:[%s3876_s3 + $0x4f8] sm:$0xff] }
 0x19e   :  { %1798 = vmatpush1.msra.mxu1 %v221_v47  ;;  %1593 = vmatprep.subr.mxu0 %v3916_v7  ;;  %v144_v47 = vld [vmem:[%s3876_s3 + $0x270] sm:$0xff] }
 0x19f   :  { %1799 = vmatprep.subr.mxu1 %v3916_v7  ;;  %1594 = vmatpush2.msra.mxu0 %v196_v43  ;;  %v143_v43 = vld [vmem:[%s3876_s3 + $0x268] sm:$0xff] }
 0x1a0   :  { %1800 = vmatpush1.msra.mxu1 %v220_v41  ;;  %1595 = vmatprep.subr.mxu0 %v3916_v7  ;;  %v223_v41 = vld [vmem:[%s3876_s3 + $0x4e8] sm:$0xff] }
 0x1a1   :  { %1690 = vmatmul.mubr.f32.gmra.mxu1 %v3257_v29  ;;  %1801 = vmatprep.subr.mxu1 %v3916_v7 }
 0x1a2   :  { %1596 = vmatpush2.msra.mxu0 %v195_v38  ;;  %2203 = vmatprep.mubr.msk.f32.mxu1 %vm1349_vm1, %v3292_v22  ;;  %v222_v38 = vld [vmem:[%s3876_s3 + $0x4e0] sm:$0xff] }
 0x1a3   :  { %1802 = vmatpush1.msra.mxu1 %v219_v36  ;;  %1597 = vmatprep.subr.mxu0 %v3916_v7  ;;  %v141_v36 = vld [vmem:[%s3876_s3 + $0x258] sm:$0xff] }
 0x1a4   :  { %1803 = vmatprep.subr.mxu1 %v3916_v7  ;;  %1598 = vmatpush2.msra.mxu0 %v194_v55  ;;  %v2299_v55 = vpop.eup %2298 }
 0x1a5   :  { %1804 = vmatpush1.msra.mxu1 %v218_v46  ;;  %1600 = vmatmul.mubr.f32.vlgmr.msra.gmra.mxu0 %v3257_v29  ;;  %v136_v29 = vld [vmem:[%s3876_s3 + $0x230] sm:$0xff]  ;;  %v139_v46 = vld [vmem:[%s3876_s3 + $0x248] sm:$0xff] }
 0x1a6   :  { %1695 = vmatmul.mubr.f32.gmra.mxu1 %v3313_v35  ;;  %1708 = vmatprep.subr.mxu0 %v3916_v7 }
 0x1a7   :  { %1805 = vmatprep.subr.mxu1 %v3916_v7  ;;  %2198 = vmatprep.mubr.msk.f32.mxu0 %vm1349_vm1, %v3292_v22 }
 0x1a8   :  { %2204 = vmatprep.mubr.msk.f32.mxu1 %vm1349_vm1, %v3341_v16  ;;  %1709 = vmatpush1.msra.mxu0 %v137_v6  ;;  %v2301_v6 = vpop.eup %2300 }
 0x1a9   :  { %1806 = vmatpush1.msra.mxu1 %v217_v18  ;;  %1710 = vmatprep.subr.mxu0 %v3916_v7  ;;  %v138_v18 = vld [vmem:[%s3876_s3 + $0x240] sm:$0xff] }
 0x1aa   :  { %1807 = vmatprep.subr.mxu1 %v3916_v7  ;;  %1711 = vmatpush1.msra.mxu0 %v136_v29  ;;  %v2188_v29 = vadd.f32 -1.0, %v2299_v55 }
 0x1ab   :  { %1808 = vmatpush1.msra.mxu1 %v216_v20  ;;  %1605 = vmatmul.mubr.f32.gmra.mxu0 %v3313_v35  ;;  %v2187_v20 = vadd.f32 -1.0, %v2301_v6 }
 0x1ac   :  { %1700 = vmatmul.mubr.f32.gmra.mxu1 %v3359_v26  ;;  %1712 = vmatprep.subr.mxu0 %v3916_v7 }
 0x1ad   :  { %1809 = vmatprep.subr.mxu1 %v3916_v7  ;;  %2199 = vmatprep.mubr.msk.f32.mxu0 %vm1349_vm1, %v3341_v16 }
 0x1ae   :  { %1713 = vmatpush1.msra.mxu0 %v135_v11  ;;  %1810 = vmatpush1.msra.mxu1 %v215_v28  ;;  %v1348_v11 = vsel %vm1288_vm12, %v3297_v45, %v2188_v29  ;;  %v1347_v28 = vsel %vm1287_vm13, %v3289_v19, %v2187_v20 }
 0x1af   :  { %2209 = vmatprep.mubr.msk.f32.mxu1 %vm1349_vm1, %v3292_v22  ;;  %1714 = vmatprep.subr.mxu0 %v3916_v7 }
 0x1b0   :  { %1811 = vmatprep.subr.mxu1 %v3916_v7  ;;  %1715 = vmatpush1.msra.mxu0 %v134_v33 }
 0x1b1   :  { %1812 = vmatpush1.msra.mxu1 %v214_v51  ;;  %1610 = vmatmul.mubr.f32.gmra.mxu0 %v3359_v26 }
 0x1b2   :  { %1716 = vmatprep.subr.mxu0 %v3916_v7  ;;  %1813 = vmatprep.subr.mxu1 %v3916_v7 }
 0x1b3   :  { %2200 = vmatprep.mubr.msk.f32.mxu0 %vm1349_vm1, %v3389_v37  ;;  %1717 = vmatpush1.msra.mxu0 %v133_v57 }
 0x1b4   :  { %1814 = vmatpush1.msra.mxu1 %v213_v12  ;;  %1718 = vmatprep.subr.mxu0 %v3916_v7 }
 0x1b5   :  { %1815 = vmatprep.subr.mxu1 %v3916_v7  ;;  %1719 = vmatpush1.msra.mxu0 %v132_v25 }
 0x1b6   :  { %1816 = vmatpush1.msra.mxu1 %v212_v56  ;;  %1615 = vmatmul.mubr.f32.gmra.mxu0 %v3405_v9 }
 0x1b7   :  { %1720 = vmatprep.subr.mxu0 %v3916_v7  ;;  %1817 = vmatprep.subr.mxu1 %v3916_v7 }
 0x1b8   :  { %1721 = vmatpush1.msra.mxu0 %v131_v62  ;;  %2205 = vmatprep.mubr.msk.f32.mxu0 %vm1349_vm1, %v3292_v22  ;;  %v128_v22 = vld [vmem:[%s3876_s3 + $0x1f0] sm:$0xff] }
 0x1b9   :  { %1818 = vmatpush1.msra.mxu1 %v211_v23  ;;  %1722 = vmatprep.subr.mxu0 %v3916_v7 }
 0x1ba   :  { %1819 = vmatprep.subr.mxu1 %v3916_v7  ;;  %1723 = vmatpush1.msra.mxu0 %v130_v21 }
 0x1bb   :  { %1820 = vmatpush1.msra.mxu1 %v210_v24  ;;  %1724 = vmatprep.subr.mxu0 %v3916_v7  ;;  %v239_v24 = vld [vmem:[%s3878_s5 + $0x28] sm:$0xff] }
 0x1bc   :  { %1821 = vmatprep.subr.mxu1 %v3916_v7  ;;  %1725 = vmatpush1.msra.mxu0 %v129_v30 }
 0x1bd   :  { %1822 = vmatpush1.msra.mxu1 %v209_v27  ;;  %1726 = vmatprep.subr.mxu0 %v3916_v7 }
 0x1be   :  { %1823 = vmatprep.subr.mxu1 %v3916_v7  ;;  %1727 = vmatpush1.msra.mxu0 %v128_v22 }
 0x1bf   :  { %1824 = vmatpush1.msra.mxu1 %v208_v39  ;;  %1728 = vmatprep.subr.mxu0 %v3916_v7  ;;  %v238_v39 = vld [vmem:[%s3878_s5 + $0x20] sm:$0xff] }
 0x1c0   :  { %1825 = vmatprep.subr.mxu1 %v3916_v7  ;;  %1729 = vmatpush1.msra.mxu0 %v127_v3  ;;  %v249_v3 = vld [vmem:[%s3878_s5 + $0x78] sm:$0xff] }
 0x1c1   :  { %1826 = vmatpush1.msra.mxu1 %v207_v34  ;;  %1730 = vmatprep.subr.mxu0 %v3916_v7  ;;  %v237_v34 = vld [vmem:[%s3878_s5 + $0x18] sm:$0xff] }
 0x1c2   :  { %1827 = vmatprep.subr.mxu1 %v3916_v7  ;;  %1731 = vmatpush1.msra.mxu0 %v126_v10  ;;  %v248_v10 = vld [vmem:[%s3878_s5 + $0x70] sm:$0xff] }
 0x1c3   :  { %1828 = vmatpush1.msra.mxu1 %v206_v15  ;;  %1732 = vmatprep.subr.mxu0 %v3916_v7  ;;  %v236_v15 = vld [vmem:[%s3878_s5 + $0x10] sm:$0xff] }
 0x1c4   :  { %1837 = vmatprep.subr.mxu1 %v3916_v7  ;;  %1733 = vmatpush1.msra.mxu0 %v125_v8  ;;  %v247_v8 = vld [vmem:[%s3878_s5 + $0x68] sm:$0xff] }
 0x1c5   :  { %1838 = vmatpush2.msra.mxu1 %v233_v2  ;;  %1734 = vmatprep.subr.mxu0 %v3916_v7  ;;  %v235_v2 = vld [vmem:[%s3878_s5 + $0x8] sm:$0xff] }
 0x1c6   :  { %1839 = vmatprep.subr.mxu1 %v3916_v7  ;;  %1735 = vmatpush1.msra.mxu0 %v124_v1  ;;  %v246_v1 = vld [vmem:[%s3878_s5 + $0x60] sm:$0xff] }
 0x1c7   :  { %1840 = vmatpush2.msra.mxu1 %v232_v54  ;;  %1736 = vmatprep.subr.mxu0 %v3916_v7  ;;  %v234_v54 = vld [vmem:[%s3878_s5] sm:$0xff] }
 0x1c8   :  { %1841 = vmatprep.subr.mxu1 %v3916_v7  ;;  %1737 = vmatpush1.msra.mxu0 %v123_v50 }
 0x1c9   :  { %1842 = vmatpush2.msra.mxu1 %v231_v31  ;;  %1738 = vmatprep.subr.mxu0 %v3916_v7 }
 0x1ca   :  { %1843 = vmatprep.subr.mxu1 %v3916_v7  ;;  %1739 = vmatpush1.msra.mxu0 %v122_v32  ;;  %v245_v32 = vld [vmem:[%s3878_s5 + $0x58] sm:$0xff] }
 0x1cb   :  { %1844 = vmatpush2.msra.mxu1 %v230_v58  ;;  %1748 = vmatprep.subr.mxu0 %v3916_v7  ;;  %v244_v58 = vld [vmem:[%s3878_s5 + $0x50] sm:$0xff] }
 0x1cc   :  { %1845 = vmatprep.subr.mxu1 %v3916_v7  ;;  %1749 = vmatpush2.msra.mxu0 %v149_v42  ;;  %v243_v42 = vld [vmem:[%s3878_s5 + $0x48] sm:$0xff] }
 0x1cd   :  { %1846 = vmatpush2.msra.mxu1 %v229_v60  ;;  %1750 = vmatprep.subr.mxu0 %v3916_v7  ;;  %v242_v60 = vld [vmem:[%s3878_s5 + $0x40] sm:$0xff] }
 0x1ce   :  { %1847 = vmatprep.subr.mxu1 %v3916_v7  ;;  %1751 = vmatpush2.msra.mxu0 %v148_v52 }
 0x1cf   :  { %1848 = vmatpush2.msra.mxu1 %v228_v61  ;;  %1752 = vmatprep.subr.mxu0 %v3916_v7 }
 0x1d0   :  { %1849 = vmatprep.subr.mxu1 %v3916_v7  ;;  %1753 = vmatpush2.msra.mxu0 %v147_v63 }
 0x1d1   :  { %1850 = vmatpush2.msra.mxu1 %v227_v4  ;;  %1754 = vmatprep.subr.mxu0 %v3916_v7 }
 0x1d2   :  { %1851 = vmatprep.subr.mxu1 %v3916_v7  ;;  %1755 = vmatpush2.msra.mxu0 %v146_v14 }
 0x1d3   :  { %1852 = vmatpush2.msra.mxu1 %v226_v5  ;;  %1756 = vmatprep.subr.mxu0 %v3916_v7 }
 0x1d4   :  { %1853 = vmatprep.subr.mxu1 %v3916_v7  ;;  %1757 = vmatpush2.msra.mxu0 %v145_v44 }
 0x1d5   :  { %1854 = vmatpush2.msra.mxu1 %v225_v17  ;;  %1758 = vmatprep.subr.mxu0 %v3916_v7 }
 0x1d6   :  { %1855 = vmatprep.subr.mxu1 %v3916_v7  ;;  %1759 = vmatpush2.msra.mxu0 %v144_v47 }
 0x1d7   :  { %1856 = vmatpush2.msra.mxu1 %v224_v0  ;;  %1760 = vmatprep.subr.mxu0 %v3916_v7 }
 0x1d8   :  { %1857 = vmatprep.subr.mxu1 %v3916_v7  ;;  %1761 = vmatpush2.msra.mxu0 %v143_v43 }
 0x1d9   :  { %1858 = vmatpush2.msra.mxu1 %v223_v41  ;;  %1762 = vmatprep.subr.mxu0 %v3916_v7 }
 0x1da   :  { %1859 = vmatprep.subr.mxu1 %v3916_v7  ;;  %1763 = vmatpush2.msra.mxu0 %v142_v48 }
 0x1db   :  { %1860 = vmatpush2.msra.mxu1 %v222_v38  ;;  %1764 = vmatprep.subr.mxu0 %v3916_v7 }
 0x1dc   :  { %1862 = vmatmul.mubr.f32.vlgmr.msra.gmra.mxu1 %v3313_v35  ;;  %1765 = vmatpush2.msra.mxu0 %v141_v36 }
 0x1dd   :  { %2210 = vmatprep.mubr.msk.f32.mxu1 %vm1349_vm1, %v3341_v16  ;;  %1766 = vmatprep.subr.mxu0 %v3916_v7 }
 0x1de   :  { %2257 = vmatprep.subr.mxu1 %v3916_v7  ;;  %1767 = vmatpush2.msra.mxu0 %v140_v53 }
 0x1df   :  { %1768 = vmatprep.subr.mxu0 %v3916_v7 }
 0x1e0   :  { %1867 = vmatmul.mubr.f32.gmra.mxu1 %v3359_v26  ;;  %1769 = vmatpush2.msra.mxu0 %v139_v46 }
 0x1e1   :  { %2211 = vmatprep.mubr.msk.f32.mxu1 %vm1349_vm1, %v3389_v37  ;;  %1770 = vmatprep.subr.mxu0 %v3916_v7 }
 0x1e2   :  { %1771 = vmatpush2.msra.mxu0 %v138_v18 }
 0x1e3   :  { %1773 = vmatmul.mubr.f32.vlgmr.msra.gmra.mxu0 %v3313_v35  ;;  %2238 = vmatprep.subr.mxu0 %v3916_v7 }
 0x1e4   :  { %1872 = vmatmul.mubr.f32.gmra.mxu1 %v3405_v9  ;;  %2206 = vmatprep.mubr.msk.f32.mxu0 %vm1349_vm1, %v3341_v16 }
 0x1e5   :  { %2212 = vmatprep.mubr.msk.f32.mxu1 %vm1349_vm1, %v1348_v11  ;;  %2239 = vmatpush3.msra.mxu0 %v249_v3 }
 0x1e6   :  { %2240 = vmatprep.subr.mxu0 %v3916_v7 }
 0x1e7   :  { %1778 = vmatmul.mubr.f32.gmra.mxu0 %v3359_v26 }
 0x1e8   :  { %1877 = vmatmul.mubr.f32.gmra.mxu1 %v1347_v28  ;;  %2207 = vmatprep.mubr.msk.f32.mxu0 %vm1349_vm1, %v3389_v37  ;;  %v241_v37 = vld [vmem:[%s3878_s5 + $0x38] sm:$0xff] }
 0x1e9   :  { %2258 = vmatpush3.msra.mxu1 %v241_v37  ;;  %2241 = vmatpush3.msra.mxu0 %v248_v10 }
 0x1ea   :  { %2259 = vmatprep.subr.mxu1 %v3916_v7  ;;  %2242 = vmatprep.subr.mxu0 %v3916_v7 }
 0x1eb   :  { %1783 = vmatmul.mubr.f32.gmra.mxu0 %v3405_v9  ;;  %v240_v9 = vld [vmem:[%s3878_s5 + $0x30] sm:$0xff]  ;;  %2273 = vmatprep.mubr.msk.f32.mxu1 %vm2313_vm14, %v3916_v7 }
 0x1ec   :  { %2208 = vmatprep.mubr.msk.f32.mxu0 %vm1349_vm1, %v1348_v11  ;;  %2260 = vmatpush3.msra.mxu1 %v240_v9 }
 0x1ed   :  { %2261 = vmatprep.subr.mxu1 %v3916_v7  ;;  %2243 = vmatpush3.msra.mxu0 %v247_v8 }
 0x1ee   :  { %2262 = vmatpush3.msra.mxu1 %v239_v24  ;;  %2244 = vmatprep.subr.mxu0 %v3916_v7 }
 0x1ef   :  { %1788 = vmatmul.mubr.f32.gmra.mxu0 %v1347_v28  ;;  %2263 = vmatprep.subr.mxu1 %v3916_v7 }
 0x1f0   :  { %2264 = vmatpush3.msra.mxu1 %v238_v39  ;;  %2245 = vmatpush3.msra.mxu0 %v246_v1 }
 0x1f1   :  { %2265 = vmatprep.subr.mxu1 %v3916_v7  ;;  %2246 = vmatprep.subr.mxu0 %v3916_v7 }
 0x1f2   :  { %2266 = vmatpush3.msra.mxu1 %v237_v34  ;;  %2254 = vmatprep.mubr.msk.f32.mxu0 %vm2313_vm14, %v3916_v7 }
 0x1f3   :  { %2267 = vmatprep.subr.mxu1 %v3916_v7  ;;  %2247 = vmatpush3.msra.mxu0 %v245_v32 }
 0x1f4   :  { %2268 = vmatpush3.msra.mxu1 %v236_v15  ;;  %2248 = vmatprep.subr.mxu0 %v3916_v7 }
 0x1f5   :  { %2269 = vmatprep.subr.mxu1 %v3916_v7  ;;  %2249 = vmatpush3.msra.mxu0 %v244_v58 }
 0x1f6   :  { %2270 = vmatpush3.msra.mxu1 %v235_v2  ;;  %2250 = vmatprep.subr.mxu0 %v3916_v7 }
 0x1f7   :  { %2271 = vmatprep.subr.mxu1 %v3916_v7  ;;  %2251 = vmatpush3.msra.mxu0 %v243_v42 }
 0x1f8   :  { %2272 = vmatpush3.msra.mxu1 %v234_v54  ;;  %2252 = vmatprep.subr.mxu0 %v3916_v7 }
 0x1f9   :  { %2253 = vmatpush3.msra.mxu0 %v242_v60 }
 0x21c   :  { %v1516_v45 = vpop.f32.mrf.mxu1 }
 0x21e   :  { %v1518_v35 = vpop.f32.mrf.mxu1 }
 0x225   :  { %v1428_v16 = vpop.f32.mrf.mxu0 }
 0x226   :  { %v1521_v33 = vpop.f32.mrf.mxu1  ;;  %v3786_v51 = vadd.f32 %v1516_v45, %v1428_v16 }
 0x227   :  { %v1430_v57 = vpop.f32.mrf.mxu0 }
 0x228   :  { %v1523_v12 = vpop.f32.mrf.mxu1 }
 0x22f   :  { %v1433_v19 = vpop.f32.mrf.mxu0 }
 0x230   :  { %v1526_v25 = vpop.f32.mrf.mxu1  ;;  %v3788_v26 = vadd.f32 %v1521_v33, %v1433_v19 }
 0x231   :  { %v1435_v56 = vpop.f32.mrf.mxu0 }
 0x232   :  { %v1528_v62 = vpop.f32.mrf.mxu1 }
 0x239   :  { %v1438_v23 = vpop.f32.mrf.mxu0 }
 0x23a   :  { %v1531_v21 = vpop.f32.mrf.mxu1  ;;  %v3801_v30 = vadd.f32 %v1526_v25, %v1438_v23 }
 0x23b   :  { %v1440_v27 = vpop.f32.mrf.mxu0 }
 0x23c   :  { %v1533_v22 = vpop.f32.mrf.mxu1 }
 0x243   :  { %v1443_v50 = vpop.f32.mrf.mxu0 }
 0x244   :  { %v3838_v31 = vadd.f32 %v1531_v21, %v1443_v50  ;;  %v2213_v21 = vld [vmem:[%s3879_s4] ss:$0 sm:$0xff] }
 0x245   :  { %v1445_v59 = vpop.f32.mrf.mxu0 }
 0x25c   :  { %v1686_v40 = vpop.f32.mrf.mxu1 }
 0x25e   :  { %v1688_v49 = vpop.f32.mrf.mxu1 }
 0x261   :  { %v1691_v52 = vpop.f32.mrf.mxu1 }
 0x263   :  { %v1693_v61 = vpop.f32.mrf.mxu1 }
 0x265   :  { %v1601_v63 = vpop.f32.mrf.mxu0 }
 0x266   :  { %v1696_v4 = vpop.f32.mrf.mxu1  ;;  %v1687_v13 = vadd.f32 %v1686_v40, %v1601_v63 }
 0x267   :  { %v1603_v14 = vpop.f32.mrf.mxu0 }
 0x268   :  { %v1698_v5 = vpop.f32.mrf.mxu1 }
 0x26b   :  { %v1606_v44 = vpop.f32.mrf.mxu0 }
 0x26c   :  { %v1701_v17 = vpop.f32.mrf.mxu1  ;;  %v1692_v53 = vadd.f32 %v1691_v52, %v1606_v44  ;;  %v2218_v52 = vld [vmem:[%s3880_s6] ss:$0 sm:$0xff] }
 0x26d   :  { %v1608_v47 = vpop.f32.mrf.mxu0 }
 0x26e   :  { %v1703_v0 = vpop.f32.mrf.mxu1 }
 0x271   :  { %v1611_v43 = vpop.f32.mrf.mxu0 }
 0x272   :  { %v1697_v35 = vadd.f32 %v1696_v4, %v1611_v43 }
 0x273   :  { %v1613_v41 = vpop.f32.mrf.mxu0 }
 0x276   :  { %v1616_v48 = vpop.f32.mrf.mxu0 }
 0x277   :  { %v1702_v16 = vadd.f32 %v1701_v17, %v1616_v48 }
 0x278   :  { %v1618_v38 = vpop.f32.mrf.mxu0 }
 0x29c   :  { %v1863_v36 = vpop.f32.mrf.mxu1 }
 0x29d   :  { %v1882_v46 = vadd.f32 %v1863_v36, %v1687_v13 }
 0x29e   :  { %v1865_v7 = vpop.f32.mrf.mxu1 }
 0x2a0   :  { %v1868_v55 = vpop.f32.mrf.mxu1 }
 0x2a1   :  { %v1883_v6 = vadd.f32 %v1868_v55, %v1692_v53 }
 0x2a2   :  { %v1870_v18 = vpop.f32.mrf.mxu1 }
 0x2a3   :  { %v1888_v29 = vmax.f32 %v1882_v46, %v1883_v6  ;;  %v1774_v20 = vpop.f32.mrf.mxu0 }
 0x2a4   :  { %v1873_v11 = vpop.f32.mrf.mxu1  ;;  %v1793_v12 = vadd.f32 %v1774_v20, %v3786_v51 }
 0x2a5   :  { %v1776_v28 = vpop.f32.mrf.mxu0  ;;  %v1884_v19 = vadd.f32 %v1873_v11, %v1697_v35 }
 0x2a6   :  { %v1875_v45 = vpop.f32.mrf.mxu1 }
 0x2a7   :  { %v1779_v33 = vpop.f32.mrf.mxu0 }
 0x2a8   :  { %v1878_v57 = vpop.f32.mrf.mxu1  ;;  %v1794_v25 = vadd.f32 %v1779_v33, %v3788_v26 }
 0x2a9   :  { %v1885_v56 = vadd.f32 %v1878_v57, %v1702_v16  ;;  %v1781_v62 = vpop.f32.mrf.mxu0 }
 0x2aa   :  { %v1880_v37 = vpop.f32.mrf.mxu1  ;;  %v1886_v9 = vmax.f32 %v1793_v12, %v1794_v25 }
 0x2ab   :  { %v1889_v23 = vmax.f32 %v1884_v19, %v1885_v56  ;;  %v1784_v24 = vpop.f32.mrf.mxu0 }
 0x2ac   :  { %v1890_v27 = vmax.f32 %v1886_v9, %v1888_v29  ;;  %v1795_v51 = vadd.f32 %v1784_v24, %v3801_v30 }
 0x2ad   :  { %v1786_v22 = vpop.f32.mrf.mxu0 }
 0x2ae   :  { %v1899_v39 = vadd.f32 %v2213_v21, %v1890_v27 }
 0x2af   :  { %v1789_v3 = vpop.f32.mrf.mxu0 }
 0x2b0   :  { %v1903_v34 = vmin.f32 %v1899_v39, 0.0  ;;  %v1796_v10 = vadd.f32 %v1789_v3, %v3838_v31  ;;  %vm1901_vm0 = vcmp.gt.f32.partialorder %v1899_v39, 0.0 }
 0x2b1   :  { %v1791_v26 = vpop.f32.mrf.mxu0 }
 0x2b2   :  { %v1905_v15 = vmul.f32 1.442695, %v1903_v34  ;;  %v1887_v8 = vmax.f32 %v1795_v51, %v1796_v10 }
 0x2b4   :  { %2302 = vpow2.f32 %v1905_v15  ;;  %v1891_v2 = vmax.f32 %v1887_v8, %v1889_v23 }
 0x2b6   :  { %v1900_v1 = vadd.f32 %v2213_v21, %v1891_v2 }
 0x2b8   :  { %v1904_v54 = vmin.f32 %v1900_v1, 0.0  ;;  %vm1902_vm1 = vcmp.gt.f32.partialorder %v1900_v1, 0.0 }
 0x2ba   :  { %v1907_v50 = vmul.f32 1.442695, %v1904_v54 }
 0x2bc   :  { %2304 = vpow2.f32 %v1907_v50 }
 0x2c1   :  { %v2303_v59 = vpop.eup %2302 }
 0x2c2   :  { %v2214_v32 = vadd.f32 -1.0, %v2303_v59 }
 0x2c4   :  { %v1911_v58 = vsel %vm1901_vm0, %v1899_v39, %v2214_v32 }
 0x2c5   :  { %2274 = vmatmul.mubr.msk.f32.vlgmr.msra.gmra.mxu1 %vm1913_vm15, %v1911_v58 }
 0x2c9   :  { %v2305_v42 = vpop.eup %2304 }
 0x2ca   :  { %v2215_v60 = vadd.f32 -1.0, %v2305_v42 }
 0x2cc   :  { %v1912_v30 = vsel %vm1902_vm1, %v1900_v1, %v2215_v60 }
 0x2cd   :  { %2255 = vmatmul.mubr.msk.f32.vlgmr.msra.gmra.mxu0 %vm1913_vm15, %v1912_v30 }
 0x385   :  { %v2056_v31 = vpop.f32.mrf.mxu1 }
 0x387   :  { %v2275_v40 = vpop.f32.mrf.mxu1 }
 0x38d   :  { %v1983_v49 = vpop.f32.mrf.mxu0 }
 0x38e   :  { %v2057_v61 = vadd.f32 %v2056_v31, %v1983_v49 }
 0x38f   :  { %v2256_v63 = vpop.f32.mrf.mxu0 }
 0x390   :  { %v2067_v4 = vadd.f32 %v2218_v52, %v2057_v61 }
 0x392   :  { %v2069_v13 = vmin.f32 %v2067_v4, 0.0  ;;  %vm2068_vm3 = vcmp.gt.f32.partialorder %v2067_v4, 0.0 }
 0x394   :  { %v2070_v14 = vmul.f32 1.442695, %v2069_v13 }
 0x396   :  { %2306 = vpow2.f32 %v2070_v14 }
 0x3a3   :  { %v2307_v5 = vpop.eup %2306 }
 0x3a4   :  { %v2219_v44 = vadd.f32 -1.0, %v2307_v5 }
 0x3a6   :  { %v2073_v17 = vsel %vm2068_vm3, %v2067_v4, %v2219_v44 }
 0x3a7   :  { %v2075_v47 = vsel %vm2074_vm2, %v2073_v17, -inf }
 0x3a8   :  { %2076 = vmax.xlane.f32.xlu0 %v2075_v47 }
 0x431   :  { %v2077_v0 = vpop.xlane.xlu0 %2076 }
 0x432   :  { %v2078_v43 = vsub.f32 %v2073_v17, %v2077_v0 }
 0x434   :  { %v2079_v41 = vmul.f32 1.442695, %v2078_v43 }
 0x436   :  { %2308 = vpow2.f32 %v2079_v41 }
 0x443   :  { %v2309_v48 = vpop.eup %2308 }
 0x444   :  { %v2081_v38 = vsel %vm2074_vm2, %v2309_v48, 0.0 }
 0x445   :  { %2082 = vadd.xlane.f32.xlu0 %v2081_v38 }
 0x4ce   :  { %v2083_v36 = vpop.xlane.xlu0 %2082 }
 0x4cf   :  { %2310 = vlog2.f32 %v2083_v36 }
 0x4dc   :  { %v2311_v7 = vpop.eup %2310 }
 0x4dd   :  { %v2085_v53 = vmul.f32 0.6931472, %v2311_v7 }
 0x4df   :  { %v2086_v55 = vadd.f32 %v2085_v53, %v2077_v0 }
 0x4e1   :  { %v2087_v46 = vsub.f32 %v2073_v17, %v2086_v55 }
 0x4e3   :  { %2088 = vst.msk [vmem:[%s3881_s7] sm:$0xff] %vm2074_vm2, %v2087_v46 }

</bundles_post_ra>
